<compile_context>
chip_gen: v7x
topology: tpu7x:2x2x1
jax: 0.10.0
libtpu: 0.0.40
codegen_flags: <defaults>
</compile_context>

<pallas_src>
import functools

import numpy as np
import jax
import jax.numpy as jnp
from jax import lax
from jax.experimental import pallas as pl
from jax.experimental.pallas import tpu as pltpu


def _convt_fused_kernel(x_ref, w_ref, b_ref, o_ref, patch_ref, *,
                        tap_offsets, c_in_pad):
    """One batch element: all s^3 phases of the transposed conv, fused.

    x_ref     : (C_in_pad, L_pad)       zero-padded, spatially-flattened input
    w_ref     : (s^3*C_out, KRED)       fused per-phase folded weights
    b_ref     : (s^3*C_out, 1)          per-phase-row bias (f32)
    o_ref     : (s^3*C_out, F_store)    lane-dense flat output slabs
    patch_ref : (KRED, F_store) VMEM    shared im2col patch scratch
    """
    f = patch_ref.shape[1]
    # Build the shared im2col patch: each shared tap is a lane-contiguous,
    # statically-offset ref slice of the flattened input; the scratch writes are
    # sublane-aligned because c_in_pad is a sublane multiple.
    for t, off in enumerate(tap_offsets):                       # static unroll
        patch_ref[t * c_in_pad:(t + 1) * c_in_pad, :] = x_ref[:, off:off + f]
    # One fused MXU matmul covering every phase and every valid kernel tap.
    acc = jnp.dot(w_ref[...], patch_ref[...],
                  preferred_element_type=jnp.float32)           # (R, F) f32
    o_ref[...] = (acc + b_ref[...]).astype(o_ref.dtype)         # bias added once


def _axis_slot_info(n_in, k, s, p):
    """Static per-axis phase geometry of the transposed conv (python ints).

    Returns (n_out, n_pad, kp, t_axis, b_min, cnt_max, slots); slots[o0] =
    (b0, cnt, {shared_tap_offset: kernel_index}) where o0 = output index mod s.
    """
    kp = -(-k // s)
    n_out = (n_in - 1) * s - 2 * p + k
    raw = []
    for o0 in range(s):
        r = (o0 + p) % s                   # kernel-tap residue for this slot
        b0 = (o0 + p) // s                 # window base (padded input coords)
        cnt = -(-(n_out - o0) // s) if o0 < n_out else 0
        taps = {}
        for jd in range(kp):
            kd = r + (kp - 1 - jd) * s
            if kd < k:
                taps[jd] = kd
        raw.append((b0, cnt, taps))
    b_min = min(b0 for b0, _, _ in raw)
    t_axis = max(b0 - b_min for b0, _, _ in raw) + kp
    cnt_max = max(cnt for _, cnt, _ in raw)
    n_pad = max(n_in + kp - 1,
                max(b0 + cnt + kp - 1 for b0, cnt, _ in raw))
    slots = []
    for b0, cnt, taps in raw:
        delta = b0 - b_min
        slots.append((b0, cnt, {delta + jd: kd for jd, kd in taps.items()}))
    return n_out, n_pad, kp, t_axis, b_min, cnt_max, slots


@functools.partial(jax.jit, static_argnames=("stride", "padding"))
def conv_transpose_3d(x, weight, bias, *, stride, padding):
    """x: (N, C_in, D, H, W); weight: (C_in, C_out, K, K, K); bias: (C_out,).

    Returns (N, C_out, D_out, H_out, W_out) matching nn.ConvTranspose3d.
    """
    N, C_in, D, H, W = x.shape
    C_in_w, C_out, K, K2, K3 = weight.shape
    assert C_in == C_in_w and K == K2 == K3
    s, p = int(stride), int(padding)
    assert s >= 1 and 0 <= p <= K - 1, "only 0 <= padding <= kernel_size-1"

    D_out, Dp, Kp, Td, bmind, Dq, d_slots = _axis_slot_info(D, K, s, p)
    H_out, Hp, _,  Th, bminh, Hq, h_slots = _axis_slot_info(H, K, s, p)
    W_out, Wp, _,  Tw, bminw, Wq, w_slots = _axis_slot_info(W, K, s, p)
    assert D_out > 0 and H_out > 0 and W_out > 0

    dtype = x.dtype
    c_sub = 8 if np.dtype(dtype).itemsize >= 4 else 16       # sublane multiple
    C_in_pad = -(-C_in // c_sub) * c_sub

    n_phase = s ** 3
    R = n_phase * C_out                                       # fused output rows
    n_tap = Td * Th * Tw
    KRED = n_tap * C_in_pad                                   # fused contraction

    # Flat output window (output lanes addressed with the padded *input's* flat
    # strides; the garbage lanes this creates are discarded in the epilogue).
    F = (Dq - 1) * Hp * Wp + (Hq - 1) * Wp + Wq
    F_store = -(-F // 128) * 128                              # lane-dense stores

    # Shared-patch tap offsets (static python ints), row-major (td, th, tw).
    tap_offsets = []
    for td in range(Td):
        for th in range(Th):
            for tw in range(Tw):
                tap_offsets.append((bmind + td) * Hp * Wp
                                   + (bminh + th) * Wp + (bminw + tw))
    L_req = tap_offsets[-1] + F_store
    L_pad = -(-max(L_req, Dp * Hp * Wp) // 128) * 128

    # Fused per-phase weights: (s^3*C_out, n_tap*C_in_pad); zero columns for
    # taps a phase does not use; C_in zero-padded to the sublane multiple.
    wp = jnp.transpose(weight, (2, 3, 4, 1, 0))               # (K,K,K,C_out,C_in)
    wp = jnp.pad(wp, ((0, 0),) * 4 + ((0, C_in_pad - C_in),))
    w_opts = jnp.concatenate(
        [wp.reshape(K ** 3, C_out, C_in_pad),
         jnp.zeros((1, C_out, C_in_pad), wp.dtype)], axis=0)  # last row = unused
    idx = np.full((n_phase, n_tap), K ** 3, dtype=np.int32)
    for sd in range(s):
        _, _, map_d = d_slots[sd]
        for sh in range(s):
            _, _, map_h = h_slots[sh]
            for sw in range(s):
                _, _, map_w = w_slots[sw]
                pi = (sd * s + sh) * s + sw
                t = 0
                for td in range(Td):
                    for th in range(Th):
                        for tw in range(Tw):
                            if td in map_d and th in map_h and tw in map_w:
                                kd, kh, kw = map_d[td], map_h[th], map_w[tw]
                                idx[pi, t] = (kd * K + kh) * K + kw
                            t += 1
    w_fold = w_opts[jnp.asarray(idx)]                         # (P, T^3, C_out, Cp)
    w_fold = jnp.transpose(w_fold, (0, 2, 1, 3)).reshape(R, KRED).astype(dtype)
    b_prep = jnp.tile(bias.astype(jnp.float32), n_phase).reshape(R, 1)

    # Input: channel-pad to sublane multiple, zero-pad spatially, flatten the
    # spatial dims, and pad the flat axis so every tap window is in bounds.
    LP = Kp - 1
    x_pad = jnp.pad(
        x, ((0, 0), (0, C_in_pad - C_in),
            (LP, Dp - D - LP), (LP, Hp - H - LP), (LP, Wp - W - LP)))
    x_flat = x_pad.reshape(N, C_in_pad, Dp * Hp * Wp).astype(dtype)
    x_flat = jnp.pad(x_flat, ((0, 0), (0, 0), (0, L_pad - Dp * Hp * Wp)))

    kernel = functools.partial(_convt_fused_kernel,
                               tap_offsets=tuple(tap_offsets),
                               c_in_pad=C_in_pad)
    z = pl.pallas_call(
        kernel,
        out_shape=jax.ShapeDtypeStruct((N, R, F_store), dtype),
        grid=(N,),
        in_specs=[
            pl.BlockSpec((pl.Squeezed(), C_in_pad, L_pad), lambda n: (n, 0, 0)),
            pl.BlockSpec((R, KRED), lambda n: (0, 0)),
            pl.BlockSpec((R, 1), lambda n: (0, 0)),
        ],
        out_specs=pl.BlockSpec((pl.Squeezed(), R, F_store), lambda n: (n, 0, 0)),
        scratch_shapes=[pltpu.VMEM((KRED, F_store), dtype)],
        compiler_params=pltpu.CompilerParams(
            dimension_semantics=("parallel",)),   # N=2 balances v7x's two TCs
    )(x_flat, w_fold, b_prep)

    # De-interleave the s^3 phase slabs with one pad/slice + reshape + slice +
    # transpose + reshape + slice (single-pass XLA glue, no strided scatters).
    need = Dq * Hp * Wp
    if F_store >= need:
        z = z[..., :need]
    else:
        z = jnp.pad(z, ((0, 0), (0, 0), (0, need - F_store)))
    z = z.reshape(N, s, s, s, C_out, Dq, Hp, Wp)[..., :Hq, :Wq]
    z = jnp.transpose(z, (0, 4, 5, 1, 6, 2, 7, 3))   # (N,C_out,Dq,sd,Hq,sh,Wq,sw)
    y = z.reshape(N, C_out, Dq * s, Hq * s, Wq * s)
    return y[:, :, :D_out, :H_out, :W_out]


def _reference(x, weight, bias, *, stride, padding):
    """Pure-JAX reference for nn.ConvTranspose3d (NCDHW)."""
    K = weight.shape[2]
    s, p = stride, padding
    w_conv = jnp.transpose(jnp.flip(weight, axis=(2, 3, 4)), (1, 0, 2, 3, 4))
    e = K - 1 - p
    y = lax.conv_general_dilated(
        x, w_conv,
        window_strides=(1, 1, 1),
        padding=[(e, e)] * 3,
        lhs_dilation=(s, s, s),
        dimension_numbers=("NCDHW", "OIDHW", "NCDHW"))
    return y + bias[None, :, None, None, None]


if __name__ == "__main__":
    # Module config: ConvTransposeBlock3D(in_filters, out_filters, kernel, stride, pad)
    in_filters, out_filters = 4, 8
    kernel_size, stride, padding = 3, 2, 1
    N, D, H, W = 2, 8, 8, 8

    key = jax.random.PRNGKey(0)
    kx, kw, kb = jax.random.split(key, 3)

    x = jax.random.normal(kx, (N, in_filters, D, H, W), jnp.float32)
    # nn.ConvTranspose3d weight shape: (in_channels, out_channels, kD, kH, kW)
    fan = in_filters * kernel_size ** 3
    bound = 1.0 / (fan ** 0.5)
    weight = jax.random.uniform(
        kw, (in_filters, out_filters, kernel_size, kernel_size, kernel_size),
        jnp.float32, -bound, bound)
    bias = jax.random.uniform(kb, (out_filters,), jnp.float32, -bound, bound)

    y = conv_transpose_3d(x, weight, bias, stride=stride, padding=padding)
    y = jax.block_until_ready(y)

    y_ref = _reference(x, weight, bias, stride=stride, padding=padding)
    assert y.shape == y_ref.shape, (y.shape, y_ref.shape)
    assert jnp.allclose(y, y_ref, atol=1e-4, rtol=1e-4), float(
        jnp.max(jnp.abs(y - y_ref)))

    print("KERNEL_OK")
</pallas_src>

<mosaic_0001>
module attributes {stable_mosaic.version = 11 : i64} {
  func.func @_convt_fused_kernel(%arg0: i32, %arg1: memref<1x8x896xf32, #tpu.memory_space<vmem>>, %arg2: memref<64x216xf32, #tpu.memory_space<vmem>>, %arg3: memref<64x1xf32, #tpu.memory_space<vmem>>, %arg4: memref<1x64x640xf32, #tpu.memory_space<vmem>>, %arg5: memref<216x640xf32, #tpu.memory_space<vmem>>) attributes {dimension_semantics = [#tpu.dimension_semantics<parallel>], iteration_bounds = array<i64: 2>, scalar_prefetch = 0 : i64, scratch_operands = 1 : i64, tpu.core_type = #tpu.core_type<tc>, window_params = [{transform_indices = @transform_0, window_bounds = array<i64: 1, 8, 896>}, {pipeline_mode = #tpu.pipeline_mode<synchronous>, transform_indices = @transform_1, window_bounds = array<i64: 64, 216>}, {pipeline_mode = #tpu.pipeline_mode<synchronous>, transform_indices = @transform_2, window_bounds = array<i64: 64, 1>}, {transform_indices = @transform_3, window_bounds = array<i64: 1, 64, 640>}]} {
    %c0 = arith.constant 0 : index
    %c0_0 = arith.constant 0 : index
    %c0_1 = arith.constant 0 : index
    %0 = vector.load %arg1[%c0, %c0_0, %c0_1] : memref<1x8x896xf32, #tpu.memory_space<vmem>>, vector<1x8x640xf32>
    %1 = vector.shape_cast %0 : vector<1x8x640xf32> to vector<8x640xf32>
    %c0_2 = arith.constant 0 : index
    %c0_3 = arith.constant 0 : index
    %2 = vector.load %arg5[%c0_2, %c0_3] : memref<216x640xf32, #tpu.memory_space<vmem>>, vector<8x640xf32>
    tpu.vector_store %arg5[%c0_2, %c0_3], %1 {strides = array<i32>} : memref<216x640xf32, #tpu.memory_space<vmem>>, vector<8x640xf32>,
    %c0_4 = arith.constant 0 : index
    %c0_5 = arith.constant 0 : index
    %c1 = arith.constant 1 : index
    %3 = vector.load %arg1[%c0_4, %c0_5, %c1] : memref<1x8x896xf32, #tpu.memory_space<vmem>>, vector<1x8x640xf32>
    %4 = vector.shape_cast %3 : vector<1x8x640xf32> to vector<8x640xf32>
    %c8 = arith.constant 8 : index
    %c0_6 = arith.constant 0 : index
    %5 = vector.load %arg5[%c8, %c0_6] : memref<216x640xf32, #tpu.memory_space<vmem>>, vector<8x640xf32>
    tpu.vector_store %arg5[%c8, %c0_6], %4 {strides = array<i32>} : memref<216x640xf32, #tpu.memory_space<vmem>>, vector<8x640xf32>,
    %c0_7 = arith.constant 0 : index
    %c0_8 = arith.constant 0 : index
    %c2 = arith.constant 2 : index
    %6 = vector.load %arg1[%c0_7, %c0_8, %c2] : memref<1x8x896xf32, #tpu.memory_space<vmem>>, vector<1x8x640xf32>
    %7 = vector.shape_cast %6 : vector<1x8x640xf32> to vector<8x640xf32>
    %c16 = arith.constant 16 : index
    %c0_9 = arith.constant 0 : index
    %8 = vector.load %arg5[%c16, %c0_9] : memref<216x640xf32, #tpu.memory_space<vmem>>, vector<8x640xf32>
    tpu.vector_store %arg5[%c16, %c0_9], %7 {strides = array<i32>} : memref<216x640xf32, #tpu.memory_space<vmem>>, vector<8x640xf32>,
    %c0_10 = arith.constant 0 : index
    %c0_11 = arith.constant 0 : index
    %c9 = arith.constant 9 : index
    %9 = vector.load %arg1[%c0_10, %c0_11, %c9] : memref<1x8x896xf32, #tpu.memory_space<vmem>>, vector<1x8x640xf32>
    %10 = vector.shape_cast %9 : vector<1x8x640xf32> to vector<8x640xf32>
    %c24 = arith.constant 24 : index
    %c0_12 = arith.constant 0 : index
    %11 = vector.load %arg5[%c24, %c0_12] : memref<216x640xf32, #tpu.memory_space<vmem>>, vector<8x640xf32>
    tpu.vector_store %arg5[%c24, %c0_12], %10 {strides = array<i32>} : memref<216x640xf32, #tpu.memory_space<vmem>>, vector<8x640xf32>,
    %c0_13 = arith.constant 0 : index
    %c0_14 = arith.constant 0 : index
    %c10 = arith.constant 10 : index
    %12 = vector.load %arg1[%c0_13, %c0_14, %c10] : memref<1x8x896xf32, #tpu.memory_space<vmem>>, vector<1x8x640xf32>
    %13 = vector.shape_cast %12 : vector<1x8x640xf32> to vector<8x640xf32>
    %c32 = arith.constant 32 : index
    %c0_15 = arith.constant 0 : index
    %14 = vector.load %arg5[%c32, %c0_15] : memref<216x640xf32, #tpu.memory_space<vmem>>, vector<8x640xf32>
    tpu.vector_store %arg5[%c32, %c0_15], %13 {strides = array<i32>} : memref<216x640xf32, #tpu.memory_space<vmem>>, vector<8x640xf32>,
    %c0_16 = arith.constant 0 : index
    %c0_17 = arith.constant 0 : index
    %c11 = arith.constant 11 : index
    %15 = vector.load %arg1[%c0_16, %c0_17, %c11] : memref<1x8x896xf32, #tpu.memory_space<vmem>>, vector<1x8x640xf32>
    %16 = vector.shape_cast %15 : vector<1x8x640xf32> to vector<8x640xf32>
    %c40 = arith.constant 40 : index
    %c0_18 = arith.constant 0 : index
    %17 = vector.load %arg5[%c40, %c0_18] : memref<216x640xf32, #tpu.memory_space<vmem>>, vector<8x640xf32>
    tpu.vector_store %arg5[%c40, %c0_18], %16 {strides = array<i32>} : memref<216x640xf32, #tpu.memory_space<vmem>>, vector<8x640xf32>,
    %c0_19 = arith.constant 0 : index
    %c0_20 = arith.constant 0 : index
    %c18 = arith.constant 18 : index
    %18 = vector.load %arg1[%c0_19, %c0_20, %c18] : memref<1x8x896xf32, #tpu.memory_space<vmem>>, vector<1x8x640xf32>
    %19 = vector.shape_cast %18 : vector<1x8x640xf32> to vector<8x640xf32>
    %c48 = arith.constant 48 : index
    %c0_21 = arith.constant 0 : index
    %20 = vector.load %arg5[%c48, %c0_21] : memref<216x640xf32, #tpu.memory_space<vmem>>, vector<8x640xf32>
    tpu.vector_store %arg5[%c48, %c0_21], %19 {strides = array<i32>} : memref<216x640xf32, #tpu.memory_space<vmem>>, vector<8x640xf32>,
    %c0_22 = arith.constant 0 : index
    %c0_23 = arith.constant 0 : index
    %c19 = arith.constant 19 : index
    %21 = vector.load %arg1[%c0_22, %c0_23, %c19] : memref<1x8x896xf32, #tpu.memory_space<vmem>>, vector<1x8x640xf32>
    %22 = vector.shape_cast %21 : vector<1x8x640xf32> to vector<8x640xf32>
    %c56 = arith.constant 56 : index
    %c0_24 = arith.constant 0 : index
    %23 = vector.load %arg5[%c56, %c0_24] : memref<216x640xf32, #tpu.memory_space<vmem>>, vector<8x640xf32>
    tpu.vector_store %arg5[%c56, %c0_24], %22 {strides = array<i32>} : memref<216x640xf32, #tpu.memory_space<vmem>>, vector<8x640xf32>,
    %c0_25 = arith.constant 0 : index
    %c0_26 = arith.constant 0 : index
    %c20 = arith.constant 20 : index
    %24 = vector.load %arg1[%c0_25, %c0_26, %c20] : memref<1x8x896xf32, #tpu.memory_space<vmem>>, vector<1x8x640xf32>
    %25 = vector.shape_cast %24 : vector<1x8x640xf32> to vector<8x640xf32>
    %c64 = arith.constant 64 : index
    %c0_27 = arith.constant 0 : index
    %26 = vector.load %arg5[%c64, %c0_27] : memref<216x640xf32, #tpu.memory_space<vmem>>, vector<8x640xf32>
    tpu.vector_store %arg5[%c64, %c0_27], %25 {strides = array<i32>} : memref<216x640xf32, #tpu.memory_space<vmem>>, vector<8x640xf32>,
    %c0_28 = arith.constant 0 : index
    %c0_29 = arith.constant 0 : index
    %c81 = arith.constant 81 : index
    %27 = vector.load %arg1[%c0_28, %c0_29, %c81] : memref<1x8x896xf32, #tpu.memory_space<vmem>>, vector<1x8x640xf32>
    %28 = vector.shape_cast %27 : vector<1x8x640xf32> to vector<8x640xf32>
    %c72 = arith.constant 72 : index
    %c0_30 = arith.constant 0 : index
    %29 = vector.load %arg5[%c72, %c0_30] : memref<216x640xf32, #tpu.memory_space<vmem>>, vector<8x640xf32>
    tpu.vector_store %arg5[%c72, %c0_30], %28 {strides = array<i32>} : memref<216x640xf32, #tpu.memory_space<vmem>>, vector<8x640xf32>,
    %c0_31 = arith.constant 0 : index
    %c0_32 = arith.constant 0 : index
    %c82 = arith.constant 82 : index
    %30 = vector.load %arg1[%c0_31, %c0_32, %c82] : memref<1x8x896xf32, #tpu.memory_space<vmem>>, vector<1x8x640xf32>
    %31 = vector.shape_cast %30 : vector<1x8x640xf32> to vector<8x640xf32>
    %c80 = arith.constant 80 : index
    %c0_33 = arith.constant 0 : index
    %32 = vector.load %arg5[%c80, %c0_33] : memref<216x640xf32, #tpu.memory_space<vmem>>, vector<8x640xf32>
    tpu.vector_store %arg5[%c80, %c0_33], %31 {strides = array<i32>} : memref<216x640xf32, #tpu.memory_space<vmem>>, vector<8x640xf32>,
    %c0_34 = arith.constant 0 : index
    %c0_35 = arith.constant 0 : index
    %c83 = arith.constant 83 : index
    %33 = vector.load %arg1[%c0_34, %c0_35, %c83] : memref<1x8x896xf32, #tpu.memory_space<vmem>>, vector<1x8x640xf32>
    %34 = vector.shape_cast %33 : vector<1x8x640xf32> to vector<8x640xf32>
    %c88 = arith.constant 88 : index
    %c0_36 = arith.constant 0 : index
    %35 = vector.load %arg5[%c88, %c0_36] : memref<216x640xf32, #tpu.memory_space<vmem>>, vector<8x640xf32>
    tpu.vector_store %arg5[%c88, %c0_36], %34 {strides = array<i32>} : memref<216x640xf32, #tpu.memory_space<vmem>>, vector<8x640xf32>,
    %c0_37 = arith.constant 0 : index
    %c0_38 = arith.constant 0 : index
    %c90 = arith.constant 90 : index
    %36 = vector.load %arg1[%c0_37, %c0_38, %c90] : memref<1x8x896xf32, #tpu.memory_space<vmem>>, vector<1x8x640xf32>
    %37 = vector.shape_cast %36 : vector<1x8x640xf32> to vector<8x640xf32>
    %c96 = arith.constant 96 : index
    %c0_39 = arith.constant 0 : index
    %38 = vector.load %arg5[%c96, %c0_39] : memref<216x640xf32, #tpu.memory_space<vmem>>, vector<8x640xf32>
    tpu.vector_store %arg5[%c96, %c0_39], %37 {strides = array<i32>} : memref<216x640xf32, #tpu.memory_space<vmem>>, vector<8x640xf32>,
    %c0_40 = arith.constant 0 : index
    %c0_41 = arith.constant 0 : index
    %c91 = arith.constant 91 : index
    %39 = vector.load %arg1[%c0_40, %c0_41, %c91] : memref<1x8x896xf32, #tpu.memory_space<vmem>>, vector<1x8x640xf32>
    %40 = vector.shape_cast %39 : vector<1x8x640xf32> to vector<8x640xf32>
    %c104 = arith.constant 104 : index
    %c0_42 = arith.constant 0 : index
    %41 = vector.load %arg5[%c104, %c0_42] : memref<216x640xf32, #tpu.memory_space<vmem>>, vector<8x640xf32>
    tpu.vector_store %arg5[%c104, %c0_42], %40 {strides = array<i32>} : memref<216x640xf32, #tpu.memory_space<vmem>>, vector<8x640xf32>,
    %c0_43 = arith.constant 0 : index
    %c0_44 = arith.constant 0 : index
    %c92 = arith.constant 92 : index
    %42 = vector.load %arg1[%c0_43, %c0_44, %c92] : memref<1x8x896xf32, #tpu.memory_space<vmem>>, vector<1x8x640xf32>
    %43 = vector.shape_cast %42 : vector<1x8x640xf32> to vector<8x640xf32>
    %c112 = arith.constant 112 : index
    %c0_45 = arith.constant 0 : index
    %44 = vector.load %arg5[%c112, %c0_45] : memref<216x640xf32, #tpu.memory_space<vmem>>, vector<8x640xf32>
    tpu.vector_store %arg5[%c112, %c0_45], %43 {strides = array<i32>} : memref<216x640xf32, #tpu.memory_space<vmem>>, vector<8x640xf32>,
    %c0_46 = arith.constant 0 : index
    %c0_47 = arith.constant 0 : index
    %c99 = arith.constant 99 : index
    %45 = vector.load %arg1[%c0_46, %c0_47, %c99] : memref<1x8x896xf32, #tpu.memory_space<vmem>>, vector<1x8x640xf32>
    %46 = vector.shape_cast %45 : vector<1x8x640xf32> to vector<8x640xf32>
    %c120 = arith.constant 120 : index
    %c0_48 = arith.constant 0 : index
    %47 = vector.load %arg5[%c120, %c0_48] : memref<216x640xf32, #tpu.memory_space<vmem>>, vector<8x640xf32>
    tpu.vector_store %arg5[%c120, %c0_48], %46 {strides = array<i32>} : memref<216x640xf32, #tpu.memory_space<vmem>>, vector<8x640xf32>,
    %c0_49 = arith.constant 0 : index
    %c0_50 = arith.constant 0 : index
    %c100 = arith.constant 100 : index
    %48 = vector.load %arg1[%c0_49, %c0_50, %c100] : memref<1x8x896xf32, #tpu.memory_space<vmem>>, vector<1x8x640xf32>
    %49 = vector.shape_cast %48 : vector<1x8x640xf32> to vector<8x640xf32>
    %c128 = arith.constant 128 : index
    %c0_51 = arith.constant 0 : index
    %50 = vector.load %arg5[%c128, %c0_51] : memref<216x640xf32, #tpu.memory_space<vmem>>, vector<8x640xf32>
    tpu.vector_store %arg5[%c128, %c0_51], %49 {strides = array<i32>} : memref<216x640xf32, #tpu.memory_space<vmem>>, vector<8x640xf32>,
    %c0_52 = arith.constant 0 : index
    %c0_53 = arith.constant 0 : index
    %c101 = arith.constant 101 : index
    %51 = vector.load %arg1[%c0_52, %c0_53, %c101] : memref<1x8x896xf32, #tpu.memory_space<vmem>>, vector<1x8x640xf32>
    %52 = vector.shape_cast %51 : vector<1x8x640xf32> to vector<8x640xf32>
    %c136 = arith.constant 136 : index
    %c0_54 = arith.constant 0 : index
    %53 = vector.load %arg5[%c136, %c0_54] : memref<216x640xf32, #tpu.memory_space<vmem>>, vector<8x640xf32>
    tpu.vector_store %arg5[%c136, %c0_54], %52 {strides = array<i32>} : memref<216x640xf32, #tpu.memory_space<vmem>>, vector<8x640xf32>,
    %c0_55 = arith.constant 0 : index
    %c0_56 = arith.constant 0 : index
    %c162 = arith.constant 162 : index
    %54 = vector.load %arg1[%c0_55, %c0_56, %c162] : memref<1x8x896xf32, #tpu.memory_space<vmem>>, vector<1x8x640xf32>
    %55 = vector.shape_cast %54 : vector<1x8x640xf32> to vector<8x640xf32>
    %c144 = arith.constant 144 : index
    %c0_57 = arith.constant 0 : index
    %56 = vector.load %arg5[%c144, %c0_57] : memref<216x640xf32, #tpu.memory_space<vmem>>, vector<8x640xf32>
    tpu.vector_store %arg5[%c144, %c0_57], %55 {strides = array<i32>} : memref<216x640xf32, #tpu.memory_space<vmem>>, vector<8x640xf32>,
    %c0_58 = arith.constant 0 : index
    %c0_59 = arith.constant 0 : index
    %c163 = arith.constant 163 : index
    %57 = vector.load %arg1[%c0_58, %c0_59, %c163] : memref<1x8x896xf32, #tpu.memory_space<vmem>>, vector<1x8x640xf32>
    %58 = vector.shape_cast %57 : vector<1x8x640xf32> to vector<8x640xf32>
    %c152 = arith.constant 152 : index
    %c0_60 = arith.constant 0 : index
    %59 = vector.load %arg5[%c152, %c0_60] : memref<216x640xf32, #tpu.memory_space<vmem>>, vector<8x640xf32>
    tpu.vector_store %arg5[%c152, %c0_60], %58 {strides = array<i32>} : memref<216x640xf32, #tpu.memory_space<vmem>>, vector<8x640xf32>,
    %c0_61 = arith.constant 0 : index
    %c0_62 = arith.constant 0 : index
    %c164 = arith.constant 164 : index
    %60 = vector.load %arg1[%c0_61, %c0_62, %c164] : memref<1x8x896xf32, #tpu.memory_space<vmem>>, vector<1x8x640xf32>
    %61 = vector.shape_cast %60 : vector<1x8x640xf32> to vector<8x640xf32>
    %c160 = arith.constant 160 : index
    %c0_63 = arith.constant 0 : index
    %62 = vector.load %arg5[%c160, %c0_63] : memref<216x640xf32, #tpu.memory_space<vmem>>, vector<8x640xf32>
    tpu.vector_store %arg5[%c160, %c0_63], %61 {strides = array<i32>} : memref<216x640xf32, #tpu.memory_space<vmem>>, vector<8x640xf32>,
    %c0_64 = arith.constant 0 : index
    %c0_65 = arith.constant 0 : index
    %c171 = arith.constant 171 : index
    %63 = vector.load %arg1[%c0_64, %c0_65, %c171] : memref<1x8x896xf32, #tpu.memory_space<vmem>>, vector<1x8x640xf32>
    %64 = vector.shape_cast %63 : vector<1x8x640xf32> to vector<8x640xf32>
    %c168 = arith.constant 168 : index
    %c0_66 = arith.constant 0 : index
    %65 = vector.load %arg5[%c168, %c0_66] : memref<216x640xf32, #tpu.memory_space<vmem>>, vector<8x640xf32>
    tpu.vector_store %arg5[%c168, %c0_66], %64 {strides = array<i32>} : memref<216x640xf32, #tpu.memory_space<vmem>>, vector<8x640xf32>,
    %c0_67 = arith.constant 0 : index
    %c0_68 = arith.constant 0 : index
    %c172 = arith.constant 172 : index
    %66 = vector.load %arg1[%c0_67, %c0_68, %c172] : memref<1x8x896xf32, #tpu.memory_space<vmem>>, vector<1x8x640xf32>
    %67 = vector.shape_cast %66 : vector<1x8x640xf32> to vector<8x640xf32>
    %c176 = arith.constant 176 : index
    %c0_69 = arith.constant 0 : index
    %68 = vector.load %arg5[%c176, %c0_69] : memref<216x640xf32, #tpu.memory_space<vmem>>, vector<8x640xf32>
    tpu.vector_store %arg5[%c176, %c0_69], %67 {strides = array<i32>} : memref<216x640xf32, #tpu.memory_space<vmem>>, vector<8x640xf32>,
    %c0_70 = arith.constant 0 : index
    %c0_71 = arith.constant 0 : index
    %c173 = arith.constant 173 : index
    %69 = vector.load %arg1[%c0_70, %c0_71, %c173] : memref<1x8x896xf32, #tpu.memory_space<vmem>>, vector<1x8x640xf32>
    %70 = vector.shape_cast %69 : vector<1x8x640xf32> to vector<8x640xf32>
    %c184 = arith.constant 184 : index
    %c0_72 = arith.constant 0 : index
    %71 = vector.load %arg5[%c184, %c0_72] : memref<216x640xf32, #tpu.memory_space<vmem>>, vector<8x640xf32>
    tpu.vector_store %arg5[%c184, %c0_72], %70 {strides = array<i32>} : memref<216x640xf32, #tpu.memory_space<vmem>>, vector<8x640xf32>,
    %c0_73 = arith.constant 0 : index
    %c0_74 = arith.constant 0 : index
    %c180 = arith.constant 180 : index
    %72 = vector.load %arg1[%c0_73, %c0_74, %c180] : memref<1x8x896xf32, #tpu.memory_space<vmem>>, vector<1x8x640xf32>
    %73 = vector.shape_cast %72 : vector<1x8x640xf32> to vector<8x640xf32>
    %c192 = arith.constant 192 : index
    %c0_75 = arith.constant 0 : index
    %74 = vector.load %arg5[%c192, %c0_75] : memref<216x640xf32, #tpu.memory_space<vmem>>, vector<8x640xf32>
    tpu.vector_store %arg5[%c192, %c0_75], %73 {strides = array<i32>} : memref<216x640xf32, #tpu.memory_space<vmem>>, vector<8x640xf32>,
    %c0_76 = arith.constant 0 : index
    %c0_77 = arith.constant 0 : index
    %c181 = arith.constant 181 : index
    %75 = vector.load %arg1[%c0_76, %c0_77, %c181] : memref<1x8x896xf32, #tpu.memory_space<vmem>>, vector<1x8x640xf32>
    %76 = vector.shape_cast %75 : vector<1x8x640xf32> to vector<8x640xf32>
    %c200 = arith.constant 200 : index
    %c0_78 = arith.constant 0 : index
    %77 = vector.load %arg5[%c200, %c0_78] : memref<216x640xf32, #tpu.memory_space<vmem>>, vector<8x640xf32>
    tpu.vector_store %arg5[%c200, %c0_78], %76 {strides = array<i32>} : memref<216x640xf32, #tpu.memory_space<vmem>>, vector<8x640xf32>,
    %c0_79 = arith.constant 0 : index
    %c0_80 = arith.constant 0 : index
    %c182 = arith.constant 182 : index
    %78 = vector.load %arg1[%c0_79, %c0_80, %c182] : memref<1x8x896xf32, #tpu.memory_space<vmem>>, vector<1x8x640xf32>
    %79 = vector.shape_cast %78 : vector<1x8x640xf32> to vector<8x640xf32>
    %c208 = arith.constant 208 : index
    %c0_81 = arith.constant 0 : index
    %80 = vector.load %arg5[%c208, %c0_81] : memref<216x640xf32, #tpu.memory_space<vmem>>, vector<8x640xf32>
    tpu.vector_store %arg5[%c208, %c0_81], %79 {strides = array<i32>} : memref<216x640xf32, #tpu.memory_space<vmem>>, vector<8x640xf32>,
    %c0_82 = arith.constant 0 : index
    %c0_83 = arith.constant 0 : index
    %81 = vector.load %arg2[%c0_82, %c0_83] : memref<64x216xf32, #tpu.memory_space<vmem>>, vector<64x216xf32>
    %c0_84 = arith.constant 0 : index
    %c0_85 = arith.constant 0 : index
    %82 = vector.load %arg5[%c0_84, %c0_85] : memref<216x640xf32, #tpu.memory_space<vmem>>, vector<216x640xf32>
    %cst = arith.constant dense<0.000000e+00> : vector<64x640xf32>
    %83 = tpu.matmul %81, %82, %cst {dimension_numbers = #tpu.dot_dimension_numbers<[1], [0], [0], [1], [0, 0, 1, 1], [], []>} : vector<64x216xf32>, vector<216x640xf32>, vector<64x640xf32> -> vector<64x640xf32>
    %c0_86 = arith.constant 0 : index
    %c0_87 = arith.constant 0 : index
    %84 = vector.load %arg3[%c0_86, %c0_87] : memref<64x1xf32, #tpu.memory_space<vmem>>, vector<64x1xf32>
    %85 = vector.broadcast %84 : vector<64x1xf32> to vector<64x640xf32>
    %86 = arith.addf %83, %85 : vector<64x640xf32>
    %c0_88 = arith.constant 0 : index
    %c0_89 = arith.constant 0 : index
    %c0_90 = arith.constant 0 : index
    %87 = vector.load %arg4[%c0_88, %c0_89, %c0_90] : memref<1x64x640xf32, #tpu.memory_space<vmem>>, vector<1x64x640xf32>
    %88 = vector.shape_cast %87 : vector<1x64x640xf32> to vector<64x640xf32>
    %89 = vector.shape_cast %86 : vector<64x640xf32> to vector<1x64x640xf32>
    tpu.vector_store %arg4[%c0_88, %c0_89, %c0_90], %89 {strides = array<i32>} : memref<1x64x640xf32, #tpu.memory_space<vmem>>, vector<1x64x640xf32>,
    return
  }
  func.func @transform_0(%arg0: i32) -> (i32, i32, i32) {
    %c0_i32 = arith.constant 0 : i32
    %c0_i32_0 = arith.constant 0 : i32
    %c0_i32_1 = arith.constant 0 : i32
    return %arg0, %c0_i32, %c0_i32_0 : i32, i32, i32
  }
  func.func @transform_1(%arg0: i32) -> (i32, i32) {
    %c0_i32 = arith.constant 0 : i32
    %c0_i32_0 = arith.constant 0 : i32
    %c0_i32_1 = arith.constant 0 : i32
    return %c0_i32, %c0_i32_0 : i32, i32
  }
  func.func @transform_2(%arg0: i32) -> (i32, i32) {
    %c0_i32 = arith.constant 0 : i32
    %c0_i32_0 = arith.constant 0 : i32
    %c0_i32_1 = arith.constant 0 : i32
    return %c0_i32, %c0_i32_0 : i32, i32
  }
  func.func @transform_3(%arg0: i32) -> (i32, i32, i32) {
    %c0_i32 = arith.constant 0 : i32
    %c0_i32_0 = arith.constant 0 : i32
    %c0_i32_1 = arith.constant 0 : i32
    return %arg0, %c0_i32, %c0_i32_0 : i32, i32, i32
  }
}

</mosaic_0001>

<bundles_post_ra>
// kernel: tile.8
= control target key start
LH: loop header
LB: loop body
LE: loop exit
PB: predicated region body
PF: predicated region fallthrough
CT: control target
= control target key end

     0   :  { %2 = vsyncpa [#allocation1], 0  ;;  %s44_s6 = smov [#allocation0]   ;;  %s70_s0 = inlined_call_operand.hbm [shape: f32[8], index: 0, kind: input, shape index: {}]   ;;  %s71_s1 = inlined_call_operand.vmem [shape: f32[8,8], index: 1, kind: output, shape index: {}]  }
   0x1   :  { %s9_s7 = sshll.u32 %s44_s6, 4  ;;  %s20_s10 = scalar_lea.hbm %s70_s0, 16  ;;  %s10_s7 = int_to_ptr.vmem [resolvable:$true] %s9_s7 }
   0x2   :  { %p21_p0 = scmp.ne.s32.totalorder %s70_s0, %s20_s10  ;;  %p24_p1 = scmp.lt.u32.totalorder %s20_s10, %s70_s0 }
   0x4   :  { %p26_p2 = pnand %p24_p1, %p21_p0 }
   0x6   :  { %29 = shalt.err (!%p26_p2)
}
   0x7   :  { %s30_s15 = scalar_lea.vmem %s10_s7, 16  ;;  %s34_s16 = scalar_lea.vmem %s10_s7, 32 }
   0x8   :  { %p31_p3 = scmp.ne.s32.totalorder %s10_s7, %s30_s15  ;;  %p35_p4 = scmp.lt.s32.totalorder %s10_s7, %s10_s7 }
   0x9   :  { %p36_p5 = scmp.lt.s32.totalorder %s34_s16, %s30_s15 }
   0xb   :  { %p37_p6 = por %p36_p5, %p35_p4 }
   0xd   :  { %p38_p7 = pnand %p37_p6, %p31_p3 }
   0xf   :  { %41 = shalt.err (!%p38_p7)
}
  0x10   :  { %12 = dma.hbm_to_vmem [thread:$0]  %s70_s0, 16, %s10_s7, [#allocation1]  }
  0x11   :  { %42 = dma.done.wait [#allocation1], 16  }
  0x12   :  { %43 = vsyncadd [#allocation1], 4294967280  ;;  %v16_v0 = vld [vmem:[#allocation0] ss:$0 sm:$0xff] }
  0x13   :  { %17 = vst [vmem:[%s71_s1] sm:$0xff] %v16_v0 }
  0x14   :  { %18 = vsyncpa [#allocation1], 1 }

// kernel: tile.0
= control target key start
LH: loop header
LB: loop body
LE: loop exit
PB: predicated region body
PF: predicated region fallthrough
CT: control target
= control target key end

     0   :  { %vm3_vm0 = vcmask 7168   ;;  %s84_s8 = smov 125   ;;  %s85_s13 = smov 126   ;;  %s167_s0 = inlined_call_operand.vmem [shape: f32[8,8], index: 0, kind: input, shape index: {}]   ;;  %s168_s1 = inlined_call_operand.vmem [shape: f32[64,1], index: 1, kind: output, shape index: {}]  }
   0x1   :  { %v6_v0 = vld [vmem:[%s167_s0] sm:$0xff]   ;;  %s83_s0 = smov 127   ;;  %s86_s14 = smov 124  }
   0x2   :  { %7 = vrot.lane.b32.xlu0 %v6_v0, %s83_s0  ;;  %23 = vrot.lane.b32.xlu1 %v6_v0, %s84_s8  ;;  %4 = vst.msk [vmem:[%s168_s1] ss:$8 sm:$0xf] %vm3_vm0, %v6_v0   ;;  %5 = vst.msk [vmem:[%s168_s1] ss:$8 sm:$0xf0] %vm3_vm0, %v6_v0  }
   0x3   :  { %s87_s15 = smov 123   ;;  %s88_s16 = smov 122  }
   0x4   :  { %s89_s17 = smov 121  }
   0x6   :  { %15 = vrot.lane.b32.xlu0 %v6_v0, %s85_s13  ;;  %31 = vrot.lane.b32.xlu1 %v6_v0, %s86_s14 }
   0xa   :  { %39 = vrot.lane.b32.xlu0 %v6_v0, %s87_s15  ;;  %47 = vrot.lane.b32.xlu1 %v6_v0, %s88_s16 }
   0xe   :  { %55 = vrot.lane.b32.xlu0 %v6_v0, %s89_s17 }
  0x74   :  { %v8_v1 = vpop.permute.xlu0 %7   ;;  %v24_v2 = vpop.permute.xlu1 %23  }
  0x75   :  { %62 = vst.msk [vmem:[%s168_s1 + $0x1] ss:$8 sm:$0xf] %vm3_vm0, %v8_v1   ;;  %63 = vst.msk [vmem:[%s168_s1 + $0x1] ss:$8 sm:$0xf0] %vm3_vm0, %v8_v1  }
  0x76   :  { %66 = vst.msk [vmem:[%s168_s1 + $0x3] ss:$8 sm:$0xf] %vm3_vm0, %v24_v2   ;;  %67 = vst.msk [vmem:[%s168_s1 + $0x3] ss:$8 sm:$0xf0] %vm3_vm0, %v24_v2  }
  0x78   :  { %v16_v3 = vpop.permute.xlu0 %15   ;;  %v32_v4 = vpop.permute.xlu1 %31  }
  0x79   :  { %64 = vst.msk [vmem:[%s168_s1 + $0x2] ss:$8 sm:$0xf] %vm3_vm0, %v16_v3   ;;  %65 = vst.msk [vmem:[%s168_s1 + $0x2] ss:$8 sm:$0xf0] %vm3_vm0, %v16_v3  }
  0x7a   :  { %68 = vst.msk [vmem:[%s168_s1 + $0x4] ss:$8 sm:$0xf] %vm3_vm0, %v32_v4   ;;  %69 = vst.msk [vmem:[%s168_s1 + $0x4] ss:$8 sm:$0xf0] %vm3_vm0, %v32_v4  }
  0x7c   :  { %v40_v5 = vpop.permute.xlu0 %39   ;;  %v48_v6 = vpop.permute.xlu1 %47  }
  0x7d   :  { %70 = vst.msk [vmem:[%s168_s1 + $0x5] ss:$8 sm:$0xf] %vm3_vm0, %v40_v5   ;;  %71 = vst.msk [vmem:[%s168_s1 + $0x5] ss:$8 sm:$0xf0] %vm3_vm0, %v40_v5  }
  0x7e   :  { %72 = vst.msk [vmem:[%s168_s1 + $0x6] ss:$8 sm:$0xf] %vm3_vm0, %v48_v6   ;;  %73 = vst.msk [vmem:[%s168_s1 + $0x6] ss:$8 sm:$0xf0] %vm3_vm0, %v48_v6  }
  0x80   :  { %v56_v7 = vpop.permute.xlu0 %55  }
  0x81   :  { %74 = vst.msk [vmem:[%s168_s1 + $0x7] ss:$8 sm:$0xf] %vm3_vm0, %v56_v7   ;;  %75 = vst.msk [vmem:[%s168_s1 + $0x7] ss:$8 sm:$0xf0] %vm3_vm0, %v56_v7  }

// kernel: conv_transpose_3d.1
= control target key start
LH: loop header
LB: loop body
LE: loop exit
PB: predicated region body
PF: predicated region fallthrough
CT: control target
= control target key end

     0   :  { %s2423_s12 = smov 0   ;;  %s3306_s0 = inlined_call_operand.vmem [shape: f32[2,8,896], index: 0, kind: input, shape index: {}]   ;;  %s3307_s1 = inlined_call_operand.vmem [shape: f32[64,216], index: 1, kind: input, shape index: {}]   ;;  %s3308_s2 = inlined_call_operand.vmem [shape: f32[64,1], index: 2, kind: input, shape index: {}]   ;;  %s3309_s3 = inlined_call_operand.vmem [shape: f32[2,64,640], index: 3, kind: output, shape index: {}]  }
   0x1 LB: > { %s1871_s13 = sadd.s32 4294967295, %s2372_s12   ;;  %p1875_p0 = scmp.ge.s32.totalorder %s2372_s12, 1  ;;  %s2372_s12 = sphi %s2423_s12, %s13_s12  }
   0x2   : > { %p137_p1 = scmp.lt.s32.totalorder %s2372_s12, 3 }
   0x4   : > { %p138_p2 = pnand %p1875_p0, %p137_p1 }
   0x5   : > { %p161_p3 = scmp.lt.s32.totalorder (!%p138_p2), %s1871_s13, 1  ;;  %s2374_s18 = smov (!%p138_p2), 127   ;;  %vm205_vm0 = vcmask (!%p138_p2), 1039360   ;;  %vm245_vm1 = vcmask (!%p138_p2), 1031168   ;;  %vm285_vm2 = vcmask (!%p138_p2), 973824   ;;  %vm325_vm3 = vcmask (!%p138_p2), 965632  }
   0x6   : > { %141 = sbr.rel (%p138_p2) target bundleno = 578 (0x242), region = 32  ;;  %s2375_s19 = smov (!%p138_p2), 126   ;;  %vm365_vm4 = vcmask (!%p138_p2), 957440   ;;  %vm405_vm5 = vcmask (!%p138_p2), 900096   ;;  %vm445_vm6 = vcmask (!%p138_p2), 891904   ;;  %vm1420_vm7 = vcmask (!%p138_p2), 719872  }
   0x7   : > { %s2376_s20 = smov (!%p138_p2), 119   ;;  %s2377_s21 = smov (!%p138_p2), 118   ;;  %vm485_vm8 = vcmask (!%p138_p2), 883712   ;;  %vm525_vm9 = vcmask (!%p138_p2), 384000   ;;  %vm565_vm10 = vcmask (!%p138_p2), 375808   ;;  %vm605_vm11 = vcmask (!%p138_p2), 367616  }
   0x8   : > { %s2378_s22 = smov (!%p138_p2), 117   ;;  %s2379_s23 = smov (!%p138_p2), 110   ;;  %vm3315_vm12 = vcmask (!%p138_p2), 310272   ;;  %vm3314_vm13 = vcmask (!%p138_p2), 302080   ;;  %vm3317_vm14 = vcmask (!%p138_p2), 293888   ;;  %vm3316_vm15 = vcmask (!%p138_p2), 236544  }
   0x9   : > { %s2380_s24 = smov (!%p138_p2), 109   ;;  %s2381_s25 = smov (!%p138_p2), 108  }
   0xa   : > { %s2382_s26 = smov (!%p138_p2), 47   ;;  %s2383_s27 = smov (!%p138_p2), 46  }
   0xb   : > { %s2384_s28 = smov (!%p138_p2), 45   ;;  %s2385_s29 = smov (!%p138_p2), 38  }
   0xc   : > { %s2386_s30 = smov (!%p138_p2), 37   ;;  %s2387_s4 = smov (!%p138_p2), 36  }
   0xd   : > { %s3357_s13 = smov (!%p161_p3, %s1871_s13), 1  ;;  %s2388_s5 = smov 29  }
   0xe   : > { %s2075_s14 = smul.u32 56, %s3357_s13  ;;  %s2389_s6 = smov 28  }
   0xf   : > { %s2390_s7 = smov 27   ;;  %s2391_s8 = smov 94  }
  0x10   : > { %s2437_s17 = scalar_lea.vmem %s3306_s0, %s2075_s14  ;;  %s2392_s9 = smov 93  }
  0x11   : > { %v2440_v0 = vld [vmem:[%s2437_s17] sm:$0xff]  ;;  %v2443_v1 = vld [vmem:[%s2437_s17 + $0x8] sm:$0xff]  ;;  %v2446_v2 = vld [vmem:[%s2437_s17 + $0x10] sm:$0xff]  ;;  %s2393_s10 = smov 92   ;;  %s3310_s11 = smov 85  }
  0x12   : > { %193 = vrot.lane.b32.xlu1 %v2440_v0, %s2374_s18  ;;  %v2452_v3 = vpack.i.bf16 %v2446_v2, %v2443_v1  ;;  %v2455_v4 = vld [vmem:[%s2437_s17 + $0x18] sm:$0xff]  ;;  %v2458_v5 = vld [vmem:[%s2437_s17 + $0x20] sm:$0xff]  ;;  %v2567_v8 = vld [vmem:[%s2437_s17 + $0x28] sm:$0xff]  ;;  %s3313_s14 = smov 84   ;;  %s3311_s15 = smov 83  }
  0x13   : > { %v2464_v6 = vpack.i.bf16 %v2458_v5, %v2455_v4  ;;  %v2562_v7 = vpack.i.bf16 %v2455_v4, %v2446_v2  ;;  %v2575_v9 = vpack.i.bf16 %v2567_v8, %v2458_v5  ;;  %s3312_s16 = smov 76  }
  0x14   : > { %2115 = vrot.lane.b32.xlu0 %v2452_v3, %s2374_s18 }
  0x16   : > { %2125 = vrot.lane.b32.xlu1 %v2452_v3, %s2375_s19 }
  0x18   : > { %2120 = vrot.lane.b32.xlu0 %v2464_v6, %s2374_s18 }
  0x1a   : > { %2135 = vrot.lane.b32.xlu1 %v2452_v3, %s2376_s20 }
  0x1c   : > { %2130 = vrot.lane.b32.xlu0 %v2464_v6, %s2375_s19 }
  0x1e   : > { %233 = vrot.lane.b32.xlu1 %v2440_v0, %s2375_s19 }
  0x20   : > { %2140 = vrot.lane.b32.xlu0 %v2464_v6, %s2376_s20 }
  0x22   : > { %2145 = vrot.lane.b32.xlu1 %v2452_v3, %s2377_s21 }
  0x24   : > { %273 = vrot.lane.b32.xlu0 %v2440_v0, %s2376_s20 }
  0x26   : > { %2155 = vrot.lane.b32.xlu1 %v2452_v3, %s2378_s22 }
  0x28   : > { %2150 = vrot.lane.b32.xlu0 %v2464_v6, %s2377_s21 }
  0x2a   : > { %313 = vrot.lane.b32.xlu1 %v2440_v0, %s2377_s21 }
  0x2c   : > { %2160 = vrot.lane.b32.xlu0 %v2464_v6, %s2378_s22 }
  0x2e   : > { %2165 = vrot.lane.b32.xlu1 %v2452_v3, %s2379_s23 }
  0x30   : > { %353 = vrot.lane.b32.xlu0 %v2440_v0, %s2378_s22 }
  0x32   : > { %2175 = vrot.lane.b32.xlu1 %v2452_v3, %s2380_s24 }
  0x34   : > { %2170 = vrot.lane.b32.xlu0 %v2464_v6, %s2379_s23 }
  0x36   : > { %393 = vrot.lane.b32.xlu1 %v2440_v0, %s2379_s23 }
  0x38   : > { %2180 = vrot.lane.b32.xlu0 %v2464_v6, %s2380_s24 }
  0x3a   : > { %2185 = vrot.lane.b32.xlu1 %v2452_v3, %s2381_s25 }
  0x3c   : > { %433 = vrot.lane.b32.xlu0 %v2440_v0, %s2380_s24 }
  0x3e   : > { %2195 = vrot.lane.b32.xlu1 %v2452_v3, %s2382_s26 }
  0x40   : > { %2190 = vrot.lane.b32.xlu0 %v2464_v6, %s2381_s25 }
  0x42   : > { %473 = vrot.lane.b32.xlu1 %v2440_v0, %s2381_s25 }
  0x44   : > { %2200 = vrot.lane.b32.xlu0 %v2464_v6, %s2382_s26 }
  0x46   : > { %2205 = vrot.lane.b32.xlu1 %v2452_v3, %s2383_s27 }
  0x48   : > { %513 = vrot.lane.b32.xlu0 %v2440_v0, %s2382_s26 }
  0x4a   : > { %2215 = vrot.lane.b32.xlu1 %v2452_v3, %s2384_s28 }
  0x4c   : > { %2210 = vrot.lane.b32.xlu0 %v2464_v6, %s2383_s27 }
  0x4e   : > { %553 = vrot.lane.b32.xlu1 %v2440_v0, %s2383_s27 }
  0x50   : > { %2220 = vrot.lane.b32.xlu0 %v2464_v6, %s2384_s28 }
  0x52   : > { %2225 = vrot.lane.b32.xlu1 %v2452_v3, %s2385_s29 }
  0x54   : > { %593 = vrot.lane.b32.xlu0 %v2440_v0, %s2384_s28 }
  0x56   : > { %2235 = vrot.lane.b32.xlu1 %v2452_v3, %s2386_s30 }
  0x58   : > { %2230 = vrot.lane.b32.xlu0 %v2464_v6, %s2385_s29 }
  0x5a   : > { %633 = vrot.lane.b32.xlu1 %v2440_v0, %s2385_s29 }
  0x5c   : > { %2240 = vrot.lane.b32.xlu0 %v2464_v6, %s2386_s30 }
  0x5e   : > { %2245 = vrot.lane.b32.xlu1 %v2452_v3, %s2387_s4 }
  0x60   : > { %673 = vrot.lane.b32.xlu0 %v2440_v0, %s2386_s30 }
  0x62   : > { %2255 = vrot.lane.b32.xlu1 %v2452_v3, %s2388_s5 }
  0x64   : > { %2250 = vrot.lane.b32.xlu0 %v2464_v6, %s2387_s4 }
  0x66   : > { %713 = vrot.lane.b32.xlu1 %v2440_v0, %s2387_s4 }
  0x68   : > { %2260 = vrot.lane.b32.xlu0 %v2464_v6, %s2388_s5 }
  0x6a   : > { %2265 = vrot.lane.b32.xlu1 %v2452_v3, %s2389_s6 }
  0x6c   : > { %753 = vrot.lane.b32.xlu0 %v2440_v0, %s2388_s5 }
  0x6e   : > { %2275 = vrot.lane.b32.xlu1 %v2452_v3, %s2390_s7 }
  0x70   : > { %2270 = vrot.lane.b32.xlu0 %v2464_v6, %s2389_s6 }
  0x72   : > { %793 = vrot.lane.b32.xlu1 %v2440_v0, %s2389_s6 }
  0x74   : > { %2280 = vrot.lane.b32.xlu0 %v2464_v6, %s2390_s7 }
  0x76   : > { %2285 = vrot.lane.b32.xlu1 %v2562_v7, %s2391_s8 }
  0x78   : > { %833 = vrot.lane.b32.xlu0 %v2440_v0, %s2390_s7 }
  0x7a   : > { %2295 = vrot.lane.b32.xlu1 %v2562_v7, %s2392_s9 }
  0x7c   : > { %2290 = vrot.lane.b32.xlu0 %v2575_v9, %s2391_s8 }
  0x7e   : > { %873 = vrot.lane.b32.xlu1 %v2443_v1, %s2391_s8 }
  0x80   : > { %2300 = vrot.lane.b32.xlu0 %v2575_v9, %s2392_s9 }
  0x82   : > { %2305 = vrot.lane.b32.xlu1 %v2562_v7, %s2393_s10 }
  0x84   : > { %913 = vrot.lane.b32.xlu0 %v2443_v1, %s2392_s9  ;;  %v194_v10 = vpop.permute.xlu1 %193 }
  0x86   : > { %v2116_v11 = vpop.permute.xlu0 %2115  ;;  %2315 = vrot.lane.b32.xlu1 %v2562_v7, %s3310_s11 }
  0x87   : > { %v2118_v12 = vunpack.i.h.bf16 %v2116_v11  ;;  %v2117_v13 = vunpack.i.l.bf16 %v2116_v11 }
  0x88   : > { %2310 = vrot.lane.b32.xlu0 %v2575_v9, %s2393_s10  ;;  %v2126_v14 = vpop.permute.xlu1 %2125 }
  0x89   : > { %v2128_v15 = vunpack.i.h.bf16 %v2126_v14  ;;  %v2127_v16 = vunpack.i.l.bf16 %v2126_v14  ;;  %v207_v17 = vsel %vm205_vm0, %v2117_v13, %v2118_v12  ;;  %v206_v18 = vsel %vm205_vm0, %v194_v10, %v2117_v13 }
  0x8a   : > { %v2595_v19 = vpop.permute.xlu0 %2120  ;;  %953 = vrot.lane.b32.xlu1 %v2443_v1, %s2393_s10  ;;  %v1904_v20 = vpack.c.bf16 %v207_v17, %v2443_v1  ;;  %v1906_v21 = vpack.c.bf16 %v206_v18, %v2440_v0 }
  0x8b   : > { %v2123_v22 = vunpack.i.h.bf16 %v2595_v19  ;;  %v2122_v23 = vunpack.i.l.bf16 %v2595_v19  ;;  %v247_v25 = vsel %vm245_vm1, %v2127_v16, %v2128_v15  ;;  %v2993_v19 = vld [vmem:[%s3307_s1 + $0x18] sm:$0xff] }
  0x8c   : > { %2320 = vrot.lane.b32.xlu0 %v2575_v9, %s3310_s11  ;;  %v2136_v24 = vpop.permute.xlu1 %2135  ;;  %1905 = vmatprep.subr.bf16.mxu0 %v1904_v20 }
  0x8d   : > { %v2138_v26 = vunpack.i.h.bf16 %v2136_v24  ;;  %v2137_v27 = vunpack.i.l.bf16 %v2136_v24  ;;  %1907 = vmatpush1.bf16.msra.mxu0 %v1906_v21  ;;  %v209_v28 = vsel %vm205_vm0, %v2122_v23, %v2123_v22  ;;  %v208_v29 = vsel %vm205_vm0, %v2118_v12, %v2122_v23 }
  0x8e   : > { %v2610_v30 = vpop.permute.xlu0 %2130  ;;  %2325 = vrot.lane.b32.xlu1 %v2562_v7, %s3313_s14  ;;  %v1956_v31 = vpack.c.bf16 %v209_v28, %v2455_v4  ;;  %v1958_v32 = vpack.c.bf16 %v208_v29, %v2446_v2  ;;  %v2679_v28 = vld [vmem:[%s3307_s1 + $0x8] sm:$0xff] }
  0x8f   : > { %v287_v33 = vsel %vm285_vm2, %v2137_v27, %v2138_v26  ;;  %v2133_v34 = vunpack.i.h.bf16 %v2610_v30  ;;  %v2132_v35 = vunpack.i.l.bf16 %v2610_v30  ;;  %1886 = vmatprep.mubr.msk.f32.mxu1 %vm1420_vm7, %v2679_v28  ;;  %1878 = vmatprep.mubr.msk.f32.mxu0 %vm1420_vm7, %v2679_v28  ;;  %v3029_v30 = vld [vmem:[%s3307_s1 + $0x20] sm:$0xff] }
  0x90   : > { %993 = vrot.lane.b32.xlu0 %v2443_v1, %s3310_s11  ;;  %v234_v36 = vpop.permute.xlu1 %233  ;;  %1957 = vmatprep.subr.bf16.mxu1 %v1956_v31  ;;  %v1908_v37 = vpack.c.bf16 %v287_v33, %v247_v25  ;;  %s2398_s11 = smov 75  }
  0x91   : > { %1959 = vmatpush1.bf16.msra.mxu1 %v1958_v32  ;;  %v249_v42 = vsel %vm245_vm1, %v2132_v35, %v2133_v34  ;;  %v248_v43 = vsel %vm245_vm1, %v2128_v15, %v2132_v35  ;;  %v246_v51 = vsel %vm245_vm1, %v234_v36, %v2127_v16 }
  0x92   : > { %v2621_v38 = vpop.permute.xlu0 %2140  ;;  %2335 = vrot.lane.b32.xlu1 %v2562_v7, %s3311_s15  ;;  %1909 = vmatprep.subr.bf16.mxu0 %v1908_v37 }
  0x93   : > { %v2143_v39 = vunpack.i.h.bf16 %v2621_v38  ;;  %v2142_v40 = vunpack.i.l.bf16 %v2621_v38  ;;  %v3034_v38 = vld [vmem:[%s3307_s1 + $0x38] sm:$0xff] }
  0x94   : > { %2330 = vrot.lane.b32.xlu0 %v2575_v9, %s3313_s14  ;;  %v2146_v41 = vpop.permute.xlu1 %2145 }
  0x95   : > { %v2148_v44 = vunpack.i.h.bf16 %v2146_v41  ;;  %v2147_v45 = vunpack.i.l.bf16 %v2146_v41  ;;  %v289_v46 = vsel %vm285_vm2, %v2142_v40, %v2143_v39  ;;  %v288_v47 = vsel %vm285_vm2, %v2138_v26, %v2142_v40 }
  0x96   : > { %v274_v48 = vpop.permute.xlu0 %273  ;;  %1033 = vrot.lane.b32.xlu1 %v2443_v1, %s3313_s14  ;;  %v1960_v49 = vpack.c.bf16 %v289_v46, %v249_v42  ;;  %v1962_v50 = vpack.c.bf16 %v288_v47, %v248_v43  ;;  %s2399_s14 = smov 74  }
  0x97   : > { %v286_v52 = vsel %vm285_vm2, %v274_v48, %v2137_v27  ;;  %v327_v57 = vsel %vm325_vm3, %v2147_v45, %v2148_v44 }
  0x98   : > { %v1910_v53 = vpack.c.bf16 %v286_v52, %v246_v51  ;;  %2340 = vrot.lane.b32.xlu0 %v2575_v9, %s3311_s15  ;;  %v2156_v54 = vpop.permute.xlu1 %2155  ;;  %1961 = vmatprep.subr.bf16.mxu1 %v1960_v49 }
  0x99   : > { %v2158_v55 = vunpack.i.h.bf16 %v2156_v54  ;;  %v2157_v56 = vunpack.i.l.bf16 %v2156_v54  ;;  %1963 = vmatpush1.bf16.msra.mxu1 %v1962_v50 }
  0x9a   : > { %v2644_v58 = vpop.permute.xlu0 %2150  ;;  %2345 = vrot.lane.b32.xlu1 %v2562_v7, %s3312_s16  ;;  %1911 = vmatpush1.bf16.msra.mxu0 %v1910_v53 }
  0x9b   : > { %v367_v59 = vsel %vm365_vm4, %v2157_v56, %v2158_v55  ;;  %v2153_v60 = vunpack.i.h.bf16 %v2644_v58  ;;  %v2152_v61 = vunpack.i.l.bf16 %v2644_v58  ;;  %v3053_v58 = vld [vmem:[%s3307_s1 + $0x30] sm:$0xff] }
  0x9c   : > { %1073 = vrot.lane.b32.xlu0 %v2443_v1, %s3311_s15  ;;  %v314_v62 = vpop.permute.xlu1 %313  ;;  %v1912_v63 = vpack.c.bf16 %v367_v59, %v327_v57 }
  0x9d   : > { %v329_v11 = vsel %vm325_vm3, %v2152_v61, %v2153_v60  ;;  %v328_v12 = vsel %vm325_vm3, %v2148_v44, %v2152_v61  ;;  %v326_v20 = vsel %vm325_vm3, %v314_v62, %v2147_v45 }
  0x9e   : > { %v2653_v0 = vpop.permute.xlu0 %2160  ;;  %2355 = vrot.lane.b32.xlu1 %v2562_v7, %s2398_s11  ;;  %1913 = vmatprep.subr.bf16.mxu0 %v1912_v63 }
  0x9f   : > { %v2163_v3 = vunpack.i.h.bf16 %v2653_v0  ;;  %v2162_v6 = vunpack.i.l.bf16 %v2653_v0  ;;  %v3058_v0 = vld [vmem:[%s3307_s1 + $0x48] sm:$0xff] }
  0xa0   : > { %2350 = vrot.lane.b32.xlu0 %v2575_v9, %s3312_s16  ;;  %v2166_v10 = vpop.permute.xlu1 %2165 }
  0xa1   : > { %v2168_v13 = vunpack.i.h.bf16 %v2166_v10  ;;  %v2167_v14 = vunpack.i.l.bf16 %v2166_v10  ;;  %v369_v7 = vsel %vm365_vm4, %v2162_v6, %v2163_v3  ;;  %v368_v15 = vsel %vm365_vm4, %v2158_v55, %v2162_v6 }
  0xa2   : > { %v354_v16 = vpop.permute.xlu0 %353  ;;  %1113 = vrot.lane.b32.xlu1 %v2443_v1, %s3312_s16  ;;  %v1964_v17 = vpack.c.bf16 %v369_v7, %v329_v11  ;;  %v1966_v18 = vpack.c.bf16 %v368_v15, %v328_v12 }
  0xa3   : > { %v366_v21 = vsel %vm365_vm4, %v354_v16, %v2157_v56  ;;  %v407_v27 = vsel %vm405_vm5, %v2167_v14, %v2168_v13 }
  0xa4   : > { %v1914_v23 = vpack.c.bf16 %v366_v21, %v326_v20  ;;  %2360 = vrot.lane.b32.xlu0 %v2575_v9, %s2398_s11  ;;  %v2176_v24 = vpop.permute.xlu1 %2175  ;;  %1965 = vmatprep.subr.bf16.mxu1 %v1964_v17 }
  0xa5   : > { %v2178_v25 = vunpack.i.h.bf16 %v2176_v24  ;;  %v2177_v26 = vunpack.i.l.bf16 %v2176_v24  ;;  %1967 = vmatpush1.bf16.msra.mxu1 %v1966_v18 }
  0xa6   : > { %v2681_v29 = vpop.permute.xlu0 %2170  ;;  %1195 = vrot.lane.b32.xlu1 %v2446_v2, %s2399_s14  ;;  %1915 = vmatpush1.bf16.msra.mxu0 %v1914_v23 }
  0xa7   : > { %v447_v9 = vsel %vm445_vm6, %v2177_v26, %v2178_v25  ;;  %v2173_v31 = vunpack.i.h.bf16 %v2681_v29  ;;  %v2172_v32 = vunpack.i.l.bf16 %v2681_v29  ;;  %v3077_v29 = vld [vmem:[%s3307_s1 + $0x40] sm:$0xff] }
  0xa8   : > { %1153 = vrot.lane.b32.xlu0 %v2443_v1, %s2398_s11  ;;  %v394_v33 = vpop.permute.xlu1 %393  ;;  %v1916_v35 = vpack.c.bf16 %v447_v9, %v407_v27 }
  0xa9   : > { %v409_v41 = vsel %vm405_vm5, %v2172_v32, %v2173_v31  ;;  %v408_v42 = vsel %vm405_vm5, %v2168_v13, %v2172_v32  ;;  %v406_v48 = vsel %vm405_vm5, %v394_v33, %v2167_v14 }
  0xaa   : > { %v2694_v36 = vpop.permute.xlu0 %2180  ;;  %1199 = vrot.lane.b32.xlu1 %v2458_v5, %s2399_s14  ;;  %1917 = vmatprep.subr.bf16.mxu0 %v1916_v35 }
  0xab   : > { %v2183_v2 = vunpack.i.h.bf16 %v2694_v36  ;;  %v2182_v37 = vunpack.i.l.bf16 %v2694_v36  ;;  %v3082_v36 = vld [vmem:[%s3307_s1 + $0x58] sm:$0xff] }
  0xac   : > { %1197 = vrot.lane.b32.xlu0 %v2455_v4, %s2399_s14  ;;  %v2186_v40 = vpop.permute.xlu1 %2185 }
  0xad   : > { %v2188_v43 = vunpack.i.h.bf16 %v2186_v40  ;;  %v2187_v44 = vunpack.i.l.bf16 %v2186_v40  ;;  %v449_v5 = vsel %vm445_vm6, %v2182_v37, %v2183_v2  ;;  %v448_v45 = vsel %vm445_vm6, %v2178_v25, %v2182_v37 }
  0xae   : > { %v434_v46 = vpop.permute.xlu0 %433  ;;  %203 = vrot.lane.b32.xlu1 %v2567_v8, %s2374_s18  ;;  %v1968_v4 = vpack.c.bf16 %v449_v5, %v409_v41  ;;  %v1970_v47 = vpack.c.bf16 %v448_v45, %v408_v42  ;;  %s3333_s18 = smov 84  }
  0xaf   : > { %v446_v49 = vsel %vm445_vm6, %v434_v46, %v2177_v26  ;;  %v487_v54 = vsel %vm485_vm8, %v2187_v44, %v2188_v43 }
  0xb0   : > { %v1918_v50 = vpack.c.bf16 %v446_v49, %v406_v48  ;;  %1201 = vrot.lane.b32.xlu0 %v2567_v8, %s2399_s14  ;;  %v2196_v51 = vpop.permute.xlu1 %2195  ;;  %1969 = vmatprep.subr.bf16.mxu1 %v1968_v4 }
  0xb1   : > { %v2198_v52 = vunpack.i.h.bf16 %v2196_v51  ;;  %v2197_v53 = vunpack.i.l.bf16 %v2196_v51  ;;  %1971 = vmatpush1.bf16.msra.mxu1 %v1970_v47 }
  0xb2   : > { %v2717_v55 = vpop.permute.xlu0 %2190  ;;  %243 = vrot.lane.b32.xlu1 %v2567_v8, %s2375_s19  ;;  %1919 = vmatpush1.bf16.msra.mxu0 %v1918_v50  ;;  %s3334_s19 = smov 85  }
  0xb3   : > { %v527_v56 = vsel %vm525_vm9, %v2197_v53, %v2198_v52  ;;  %v2193_v57 = vunpack.i.h.bf16 %v2717_v55  ;;  %v2192_v59 = vunpack.i.l.bf16 %v2717_v55  ;;  %v3101_v55 = vld [vmem:[%s3307_s1 + $0x50] sm:$0xff] }
  0xb4   : > { %1193 = vrot.lane.b32.xlu0 %v2443_v1, %s2399_s14  ;;  %v474_v61 = vpop.permute.xlu1 %473  ;;  %v1920_v62 = vpack.c.bf16 %v527_v56, %v487_v54 }
  0xb5   : > { %v489_v1 = vsel %vm485_vm8, %v2192_v59, %v2193_v57  ;;  %v488_v12 = vsel %vm485_vm8, %v2188_v43, %v2192_v59  ;;  %v486_v20 = vsel %vm485_vm8, %v474_v61, %v2187_v44 }
  0xb6   : > { %v2726_v63 = vpop.permute.xlu0 %2200  ;;  %323 = vrot.lane.b32.xlu1 %v2567_v8, %s2377_s21  ;;  %1921 = vmatprep.subr.bf16.mxu0 %v1920_v62  ;;  %s3336_s21 = smov 83  }
  0xb7   : > { %v2203_v6 = vunpack.i.h.bf16 %v2726_v63  ;;  %v2202_v10 = vunpack.i.l.bf16 %v2726_v63  ;;  %v3106_v63 = vld [vmem:[%s3307_s1 + $0x68] sm:$0xff] }
  0xb8   : > { %283 = vrot.lane.b32.xlu0 %v2567_v8, %s2376_s20  ;;  %v2206_v11 = vpop.permute.xlu1 %2205  ;;  %s3335_s20 = smov 76  }
  0xb9   : > { %v2208_v13 = vunpack.i.h.bf16 %v2206_v11  ;;  %v2207_v14 = vunpack.i.l.bf16 %v2206_v11  ;;  %v529_v7 = vsel %vm525_vm9, %v2202_v10, %v2203_v6  ;;  %v528_v15 = vsel %vm525_vm9, %v2198_v52, %v2202_v10 }
  0xba   : > { %v514_v16 = vpop.permute.xlu0 %513  ;;  %403 = vrot.lane.b32.xlu1 %v2567_v8, %s2379_s23  ;;  %v1972_v17 = vpack.c.bf16 %v529_v7, %v489_v1  ;;  %v1974_v18 = vpack.c.bf16 %v528_v15, %v488_v12 }
  0xbb   : > { %v526_v21 = vsel %vm525_vm9, %v514_v16, %v2197_v53  ;;  %v567_v27 = vsel %vm565_vm10, %v2207_v14, %v2208_v13 }
  0xbc   : > { %v1922_v23 = vpack.c.bf16 %v526_v21, %v486_v20  ;;  %363 = vrot.lane.b32.xlu0 %v2567_v8, %s2378_s22  ;;  %v2216_v24 = vpop.permute.xlu1 %2215  ;;  %1973 = vmatprep.subr.bf16.mxu1 %v1972_v17  ;;  %v2797_v17 = vld [vmem:[%s2437_s17 + $0x30] sm:$0xff] }
  0xbd   : > { %v2218_v25 = vunpack.i.h.bf16 %v2216_v24  ;;  %v2217_v26 = vunpack.i.l.bf16 %v2216_v24  ;;  %1975 = vmatpush1.bf16.msra.mxu1 %v1974_v18 }
  0xbe   : > { %v2749_v9 = vpop.permute.xlu0 %2210  ;;  %483 = vrot.lane.b32.xlu1 %v2567_v8, %s2381_s25  ;;  %1923 = vmatpush1.bf16.msra.mxu0 %v1922_v23 }
  0xbf   : > { %v607_v32 = vsel %vm605_vm11, %v2217_v26, %v2218_v25  ;;  %v2213_v33 = vunpack.i.h.bf16 %v2749_v9  ;;  %v2212_v35 = vunpack.i.l.bf16 %v2749_v9  ;;  %v3125_v9 = vld [vmem:[%s3307_s1 + $0x60] sm:$0xff] }
  0xc0   : > { %443 = vrot.lane.b32.xlu0 %v2567_v8, %s2380_s24  ;;  %v554_v37 = vpop.permute.xlu1 %553  ;;  %v1924_v40 = vpack.c.bf16 %v607_v32, %v567_v27 }
  0xc1   : > { %v569_v5 = vsel %vm565_vm10, %v2212_v35, %v2213_v33  ;;  %v568_v45 = vsel %vm565_vm10, %v2208_v13, %v2212_v35  ;;  %v566_v52 = vsel %vm565_vm10, %v554_v37, %v2207_v14 }
  0xc2   : > { %v2758_v41 = vpop.permute.xlu0 %2220  ;;  %563 = vrot.lane.b32.xlu1 %v2567_v8, %s2383_s27  ;;  %1925 = vmatprep.subr.bf16.mxu0 %v1924_v40 }
  0xc3   : > { %v2223_v42 = vunpack.i.h.bf16 %v2758_v41  ;;  %v2222_v43 = vunpack.i.l.bf16 %v2758_v41  ;;  %v3130_v41 = vld [vmem:[%s3307_s1 + $0x78] sm:$0xff] }
  0xc4   : > { %523 = vrot.lane.b32.xlu0 %v2567_v8, %s2382_s26  ;;  %v2226_v44 = vpop.permute.xlu1 %2225 }
  0xc5   : > { %v2228_v46 = vunpack.i.h.bf16 %v2226_v44  ;;  %v2227_v4 = vunpack.i.l.bf16 %v2226_v44  ;;  %v609_v47 = vsel %vm605_vm11, %v2222_v43, %v2223_v42  ;;  %v608_v48 = vsel %vm605_vm11, %v2218_v25, %v2222_v43 }
  0xc6   : > { %v594_v49 = vpop.permute.xlu0 %593  ;;  %643 = vrot.lane.b32.xlu1 %v2567_v8, %s2385_s29  ;;  %v1976_v50 = vpack.c.bf16 %v609_v47, %v569_v5  ;;  %v1978_v51 = vpack.c.bf16 %v608_v48, %v568_v45 }
  0xc7   : > { %v606_v53 = vsel %vm605_vm11, %v594_v49, %v2217_v26  ;;  %v647_v62 = vsel %vm3315_vm12, %v2227_v4, %v2228_v46 }
  0xc8   : > { %v1926_v54 = vpack.c.bf16 %v606_v53, %v566_v52  ;;  %603 = vrot.lane.b32.xlu0 %v2567_v8, %s2384_s28  ;;  %v2236_v56 = vpop.permute.xlu1 %2235  ;;  %1977 = vmatprep.subr.bf16.mxu1 %v1976_v50 }
  0xc9   : > { %v2238_v59 = vunpack.i.h.bf16 %v2236_v56  ;;  %v2237_v61 = vunpack.i.l.bf16 %v2236_v56  ;;  %1979 = vmatpush1.bf16.msra.mxu1 %v1978_v51 }
  0xca   : > { %v2781_v10 = vpop.permute.xlu0 %2230  ;;  %723 = vrot.lane.b32.xlu1 %v2567_v8, %s2387_s4  ;;  %1927 = vmatpush1.bf16.msra.mxu0 %v1926_v54 }
  0xcb   : > { %v687_v11 = vsel %vm3314_vm13, %v2237_v61, %v2238_v59  ;;  %v2233_v1 = vunpack.i.h.bf16 %v2781_v10  ;;  %v2232_v12 = vunpack.i.l.bf16 %v2781_v10  ;;  %v3149_v10 = vld [vmem:[%s3307_s1 + $0x70] sm:$0xff] }
  0xcc   : > { %683 = vrot.lane.b32.xlu0 %v2567_v8, %s2386_s30  ;;  %v634_v13 = vpop.permute.xlu1 %633  ;;  %v1928_v14 = vpack.c.bf16 %v687_v11, %v647_v62 }
  0xcd   : > { %v649_v20 = vsel %vm3315_vm12, %v2232_v12, %v2233_v1  ;;  %v648_v21 = vsel %vm3315_vm12, %v2228_v46, %v2232_v12  ;;  %v646_v37 = vsel %vm3315_vm12, %v634_v13, %v2227_v4  ;;  %vm3318_vm12 = vcmask 220160  }
  0xce   : > { %v2790_v7 = vpop.permute.xlu0 %2240  ;;  %803 = vrot.lane.b32.xlu1 %v2567_v8, %s2389_s6  ;;  %1929 = vmatprep.subr.bf16.mxu0 %v1928_v14 }
  0xcf   : > { %v2243_v15 = vunpack.i.h.bf16 %v2790_v7  ;;  %v2242_v16 = vunpack.i.l.bf16 %v2790_v7 }
  0xd0   : > { %763 = vrot.lane.b32.xlu0 %v2567_v8, %s2388_s5  ;;  %v2246_v18 = vpop.permute.xlu1 %2245 }
  0xd1   : > { %v2248_v23 = vunpack.i.h.bf16 %v2246_v18  ;;  %v2247_v24 = vunpack.i.l.bf16 %v2246_v18  ;;  %v689_v25 = vsel %vm3314_vm13, %v2242_v16, %v2243_v15  ;;  %v688_v26 = vsel %vm3314_vm13, %v2238_v59, %v2242_v16 }
  0xd2   : > { %v674_v27 = vpop.permute.xlu0 %673  ;;  %883 = vrot.lane.b32.xlu1 %v2797_v17, %s2391_s8  ;;  %v1980_v32 = vpack.c.bf16 %v689_v25, %v649_v20  ;;  %v1982_v35 = vpack.c.bf16 %v688_v26, %v648_v21 }
  0xd3   : > { %v686_v40 = vsel %vm3314_vm13, %v674_v27, %v2237_v61  ;;  %v727_v46 = vsel %vm3317_vm14, %v2247_v24, %v2248_v23  ;;  %vm3319_vm13 = vcmask 228352  }
  0xd4   : > { %v1930_v43 = vpack.c.bf16 %v686_v40, %v646_v37  ;;  %843 = vrot.lane.b32.xlu0 %v2567_v8, %s2390_s7  ;;  %v2256_v44 = vpop.permute.xlu1 %2255  ;;  %1981 = vmatprep.subr.bf16.mxu1 %v1980_v32 }
  0xd5   : > { %v2258_v5 = vunpack.i.h.bf16 %v2256_v44  ;;  %v2257_v45 = vunpack.i.l.bf16 %v2256_v44  ;;  %1983 = vmatpush1.bf16.msra.mxu1 %v1982_v35 }
  0xd6   : > { %v2816_v47 = vpop.permute.xlu0 %2250  ;;  %963 = vrot.lane.b32.xlu1 %v2797_v17, %s2393_s10  ;;  %1931 = vmatpush1.bf16.msra.mxu0 %v1930_v43 }
  0xd7   : > { %v767_v4 = vsel %vm3316_vm15, %v2257_v45, %v2258_v5  ;;  %v2253_v48 = vunpack.i.h.bf16 %v2816_v47  ;;  %v2252_v8 = vunpack.i.l.bf16 %v2816_v47 }
  0xd8   : > { %923 = vrot.lane.b32.xlu0 %v2797_v17, %s2392_s9  ;;  %v714_v49 = vpop.permute.xlu1 %713  ;;  %v1932_v50 = vpack.c.bf16 %v767_v4, %v727_v46 }
  0xd9   : > { %v729_v56 = vsel %vm3317_vm14, %v2252_v8, %v2253_v48  ;;  %v728_v59 = vsel %vm3317_vm14, %v2248_v23, %v2252_v8  ;;  %v726_v18 = vsel %vm3317_vm14, %v714_v49, %v2247_v24  ;;  %vm3320_vm14 = vcmask 760832  }
  0xda   : > { %v2825_v51 = vpop.permute.xlu0 %2260  ;;  %1043 = vrot.lane.b32.xlu1 %v2797_v17, %s3333_s18  ;;  %1933 = vmatprep.subr.bf16.mxu0 %v1932_v50  ;;  %s2076_s18 = smul.u32 320, %s3357_s13 }
  0xdb   : > { %v2263_v52 = vunpack.i.h.bf16 %v2825_v51  ;;  %v2262_v53 = vunpack.i.l.bf16 %v2825_v51 }
  0xdc   : > { %1003 = vrot.lane.b32.xlu0 %v2797_v17, %s3334_s19  ;;  %v2266_v54 = vpop.permute.xlu1 %2265 }
  0xdd   : > { %v2268_v61 = vunpack.i.h.bf16 %v2266_v54  ;;  %v2267_v62 = vunpack.i.l.bf16 %v2266_v54  ;;  %v769_v11 = vsel %vm3316_vm15, %v2262_v53, %v2263_v52  ;;  %v768_v12 = vsel %vm3316_vm15, %v2258_v5, %v2262_v53 }
  0xde   : > { %v754_v13 = vpop.permute.xlu0 %753  ;;  %1123 = vrot.lane.b32.xlu1 %v2797_v17, %s3335_s20  ;;  %v1984_v14 = vpack.c.bf16 %v769_v11, %v729_v56  ;;  %v1986_v16 = vpack.c.bf16 %v768_v12, %v728_v59 }
  0xdf   : > { %v766_v20 = vsel %vm3316_vm15, %v754_v13, %v2257_v45  ;;  %v807_v27 = vsel %vm3319_vm13, %v2267_v62, %v2268_v61  ;;  %vm3321_vm15 = vcmask 769024  }
  0xe0   : > { %v1934_v21 = vpack.c.bf16 %v766_v20, %v726_v18  ;;  %1083 = vrot.lane.b32.xlu0 %v2797_v17, %s3336_s21  ;;  %v2276_v23 = vpop.permute.xlu1 %2275  ;;  %1985 = vmatprep.subr.bf16.mxu1 %v1984_v14  ;;  %v1373_v18 = vld [vmem:[%s3308_s2 + $0x8] sm:$0xff]  ;;  %s3235_s21 = scalar_lea.vmem %s3309_s3, %s2076_s18 }
  0xe1   : > { %v2278_v25 = vunpack.i.h.bf16 %v2276_v23  ;;  %v2277_v26 = vunpack.i.l.bf16 %v2276_v23  ;;  %1987 = vmatpush1.bf16.msra.mxu1 %v1986_v16  ;;  %v2400_v16 = vmov 0  }
  0xe2   : > { %v2848_v32 = vpop.permute.xlu0 %2270  ;;  %1203 = vrot.lane.b32.xlu1 %v2797_v17, %s2399_s14  ;;  %1935 = vmatpush1.bf16.msra.mxu0 %v1934_v21 }
  0xe3   : > { %v847_v24 = vsel %vm3318_vm12, %v2277_v26, %v2278_v25  ;;  %v2273_v35 = vunpack.i.h.bf16 %v2848_v32  ;;  %v2272_v37 = vunpack.i.l.bf16 %v2848_v32  ;;  %2364 = vset.pattern.permute.xlu0 %v2400_v16  ;;  %2365 = vset.pattern.permute.xlu1 %v2400_v16 }
  0xe4   : > { %1163 = vrot.lane.b32.xlu0 %v2797_v17, %s2398_s11  ;;  %v794_v40 = vpop.permute.xlu1 %793  ;;  %v1936_v43 = vpack.c.bf16 %v847_v24, %v807_v27 }
  0xe5   : > { %v809_v4 = vsel %vm3319_vm13, %v2272_v37, %v2273_v35  ;;  %v808_v8 = vsel %vm3319_vm13, %v2268_v61, %v2272_v37  ;;  %v806_v11 = vsel %vm3319_vm13, %v794_v40, %v2267_v62  ;;  %v1372_v61 = vld [vmem:[%s3308_s2] sm:$0xff]  ;;  %vm3323_vm13 = vcmask 695296  }
  0xe6   : > { %v2857_v44 = vpop.permute.xlu0 %2280  ;;  %1937 = vmatprep.subr.bf16.mxu0 %v1936_v43  ;;  %1387 = vperm.xlu1 %2365, %v1373_v18   ;;  %v1374_v43 = vld [vmem:[%s3308_s2 + $0x10] sm:$0xff] }
  0xe7   : > { %v2283_v5 = vunpack.i.h.bf16 %v2857_v44  ;;  %v2282_v45 = vunpack.i.l.bf16 %v2857_v44 }
  0xe8   : > { %v2286_v46 = vpop.permute.xlu1 %2285  ;;  %1382 = vperm.xlu0 %2364, %v1372_v61  }
  0xe9   : > { %v2288_v49 = vunpack.i.h.bf16 %v2286_v46  ;;  %v2287_v50 = vunpack.i.l.bf16 %v2286_v46  ;;  %v849_v17 = vsel %vm3318_vm12, %v2282_v45, %v2283_v5  ;;  %v848_v53 = vsel %vm3318_vm12, %v2278_v25, %v2282_v45  ;;  %v1375_v25 = vld [vmem:[%s3308_s2 + $0x18] sm:$0xff]  ;;  %v1377_v46 = vld [vmem:[%s3308_s2 + $0x28] sm:$0xff] }
  0xea   : > { %v834_v54 = vpop.permute.xlu0 %833  ;;  %v1988_v56 = vpack.c.bf16 %v849_v17, %v809_v4  ;;  %v1990_v59 = vpack.c.bf16 %v848_v53, %v808_v8  ;;  %1392 = vperm.xlu1 %2365, %v1374_v43  }
  0xeb   : > { %v846_v12 = vsel %vm3318_vm12, %v834_v54, %v2277_v26  ;;  %v887_v62 = vsel %vm3321_vm15, %v2287_v50, %v2288_v49  ;;  %vm3327_vm12 = vcmask 752640  }
  0xec   : > { %v1938_v13 = vpack.c.bf16 %v846_v12, %v806_v11  ;;  %v2296_v14 = vpop.permute.xlu1 %2295  ;;  %1989 = vmatprep.subr.bf16.mxu1 %v1988_v56  ;;  %1397 = vperm.xlu0 %2364, %v1375_v25   ;;  %v1376_v56 = vld [vmem:[%s3308_s2 + $0x20] sm:$0xff] }
  0xed   : > { %v2298_v20 = vunpack.i.h.bf16 %v2296_v14  ;;  %v2297_v21 = vunpack.i.l.bf16 %v2296_v14  ;;  %1991 = vmatpush1.bf16.msra.mxu1 %v1990_v59 }
  0xee   : > { %v2878_v23 = vpop.permute.xlu0 %2290  ;;  %1939 = vmatpush1.bf16.msra.mxu0 %v1938_v13  ;;  %1402 = vperm.xlu1 %2365, %v1376_v56  }
  0xef   : > { %v927_v26 = vsel %vm3320_vm14, %v2297_v21, %v2298_v20  ;;  %v3329_v27 = vunpack.i.h.bf16 %v2878_v23  ;;  %v2292_v24 = vunpack.i.l.bf16 %v2878_v23  ;;  %v3343_v32 = vunpack.i.h.bf16 %v2878_v23 }
  0xf0   : > { %v874_v37 = vpop.permute.xlu1 %873  ;;  %v1940_v40 = vpack.c.bf16 %v927_v26, %v887_v62  ;;  %1407 = vperm.xlu0 %2364, %v1377_v46  }
  0xf1   : > { %v889_v53 = vsel %vm3321_vm15, %v2292_v24, %v3329_v27  ;;  %v888_v54 = vsel %vm3321_vm15, %v2288_v49, %v2292_v24  ;;  %v1379_v49 = vld [vmem:[%s3308_s2 + $0x38] sm:$0xff]  ;;  %v886_v18 = vsel %vm3321_vm15, %v874_v37, %v2287_v50  ;;  %vm3330_vm15 = vcmask 678912  }
  0xf2   : > { %v2889_v45 = vpop.permute.xlu0 %2300  ;;  %1941 = vmatprep.subr.bf16.mxu0 %v1940_v40 }
  0xf3   : > { %v3325_v4 = vunpack.i.h.bf16 %v2889_v45  ;;  %v2302_v8 = vunpack.i.l.bf16 %v2889_v45  ;;  %v3345_v44 = vunpack.i.h.bf16 %v2889_v45 }
  0xf4   : > { %v2306_v17 = vpop.permute.xlu1 %2305  ;;  %1417 = vperm.xlu0 %2364, %v1379_v49  }
  0xf5   : > { %v2308_v59 = vunpack.i.h.bf16 %v2306_v17  ;;  %v2307_v11 = vunpack.i.l.bf16 %v2306_v17  ;;  %v929_v12 = vsel %vm3320_vm14, %v2302_v8, %v3325_v4  ;;  %v928_v61 = vsel %vm3320_vm14, %v2298_v20, %v2302_v8  ;;  %v1378_v20 = vld [vmem:[%s3308_s2 + $0x30] sm:$0xff] }
  0xf6   : > { %v914_v13 = vpop.permute.xlu0 %913  ;;  %v1992_v14 = vpack.c.bf16 %v929_v12, %v889_v53  ;;  %v1994_v16 = vpack.c.bf16 %v928_v61, %v888_v54  ;;  %1412 = vperm.xlu1 %2365, %v1378_v20  }
  0xf7   : > { %v926_v62 = vsel %vm3320_vm14, %v914_v13, %v2297_v21  ;;  %v967_v43 = vsel %vm3327_vm12, %v2307_v11, %v2308_v59  ;;  %vm1045_vm14 = vcmask 687104  }
  0xf8   : > { %v1942_v25 = vpack.c.bf16 %v926_v62, %v886_v18  ;;  %v2316_v26 = vpop.permute.xlu1 %2315  ;;  %1993 = vmatprep.subr.bf16.mxu1 %v1992_v14 }
  0xf9   : > { %v2318_v24 = vunpack.i.h.bf16 %v2316_v26  ;;  %v2317_v40 = vunpack.i.l.bf16 %v2316_v26  ;;  %1995 = vmatpush1.bf16.msra.mxu1 %v1994_v16 }
  0xfa   : > { %v2916_v46 = vpop.permute.xlu0 %2310  ;;  %1943 = vmatpush1.bf16.msra.mxu0 %v1942_v25 }
  0xfb   : > { %v1007_v50 = vsel %vm3323_vm13, %v2317_v40, %v2318_v24  ;;  %v3324_v21 = vunpack.i.h.bf16 %v2916_v46  ;;  %v2312_v37 = vunpack.i.l.bf16 %v2916_v46 }
  0xfc   : > { %v954_v8 = vpop.permute.xlu1 %953  ;;  %v1944_v17 = vpack.c.bf16 %v1007_v50, %v967_v43 }
  0xfd   : > { %v969_v61 = vsel %vm3327_vm12, %v2312_v37, %v3324_v21  ;;  %v968_v13 = vsel %vm3327_vm12, %v2308_v59, %v2312_v37  ;;  %v966_v20 = vsel %vm3327_vm12, %v954_v8, %v2307_v11  ;;  %vm1165_vm12 = vcmask 613376  }
  0xfe   : > { %v2921_v53 = vpop.permute.xlu0 %2320  ;;  %1945 = vmatprep.subr.bf16.mxu0 %v1944_v17 }
  0xff   : > { %v3322_v54 = vunpack.i.h.bf16 %v2921_v53  ;;  %v2322_v56 = vunpack.i.l.bf16 %v2921_v53  ;;  %v3349_v23 = vunpack.i.h.bf16 %v2921_v53 }
 0x100   : > { %v2326_v12 = vpop.permute.xlu1 %2325 }
 0x101   : > { %v2328_v14 = vunpack.i.h.bf16 %v2326_v12  ;;  %v2327_v16 = vunpack.i.l.bf16 %v2326_v12  ;;  %v1009_v49 = vsel %vm3323_vm13, %v2322_v56, %v3322_v54  ;;  %v1008_v18 = vsel %vm3323_vm13, %v2318_v24, %v2322_v56 }
 0x102   : > { %v994_v62 = vpop.permute.xlu0 %993  ;;  %v1996_v25 = vpack.c.bf16 %v1009_v49, %v969_v61  ;;  %v1998_v26 = vpack.c.bf16 %v1008_v18, %v968_v13 }
 0x103   : > { %v1006_v43 = vsel %vm3323_vm13, %v994_v62, %v2317_v40  ;;  %v1047_v12 = vsel %vm1045_vm14, %v2327_v16, %v2328_v14  ;;  %vm1125_vm13 = vcmask 621568  }
 0x104   : > { %v1946_v50 = vpack.c.bf16 %v1006_v43, %v966_v20  ;;  %v2336_v17 = vpop.permute.xlu1 %2335  ;;  %1997 = vmatprep.subr.bf16.mxu1 %v1996_v25 }
 0x105   : > { %v2338_v59 = vunpack.i.h.bf16 %v2336_v17  ;;  %v2337_v37 = vunpack.i.l.bf16 %v2336_v17  ;;  %1999 = vmatpush1.bf16.msra.mxu1 %v1998_v26 }
 0x106   : > { %v2936_v54 = vpop.permute.xlu0 %2330  ;;  %1947 = vmatpush1.bf16.msra.mxu0 %v1946_v50 }
 0x107   : > { %v1087_v24 = vsel %vm3330_vm15, %v2337_v37, %v2338_v59  ;;  %v3326_v56 = vunpack.i.h.bf16 %v2936_v54  ;;  %v2332_v11 = vunpack.i.l.bf16 %v2936_v54 }
 0x108   : > { %v1034_v8 = vpop.permute.xlu1 %1033  ;;  %v1948_v40 = vpack.c.bf16 %v1087_v24, %v1047_v12 }
 0x109   : > { %v1049_v62 = vsel %vm1045_vm14, %v2332_v11, %v3326_v56  ;;  %v1048_v25 = vsel %vm1045_vm14, %v2328_v14, %v2332_v11 }
 0x10a   : > { %v2941_v61 = vpop.permute.xlu0 %2340  ;;  %1949 = vmatprep.subr.bf16.mxu0 %v1948_v40  ;;  %v1046_v40 = vsel %vm1045_vm14, %v1034_v8, %v2327_v16 }
 0x10b   : > { %v3328_v13 = vunpack.i.h.bf16 %v2941_v61  ;;  %v2342_v49 = vunpack.i.l.bf16 %v2941_v61 }
 0x10c   : > { %v2346_v18 = vpop.permute.xlu1 %2345 }
 0x10d   : > { %v2348_v26 = vunpack.i.h.bf16 %v2346_v18  ;;  %v2347_v20 = vunpack.i.l.bf16 %v2346_v18  ;;  %v1089_v43 = vsel %vm3330_vm15, %v2342_v49, %v3328_v13  ;;  %v1088_v50 = vsel %vm3330_vm15, %v2338_v59, %v2342_v49 }
 0x10e   : > { %v1074_v17 = vpop.permute.xlu0 %1073  ;;  %v2000_v12 = vpack.c.bf16 %v1089_v43, %v1049_v62  ;;  %v2002_v24 = vpack.c.bf16 %v1088_v50, %v1048_v25 }
 0x10f   : > { %v1086_v21 = vsel %vm3330_vm15, %v1074_v17, %v2337_v37  ;;  %v1127_v18 = vsel %vm1125_vm13, %v2347_v20, %v2348_v26  ;;  %vm1205_vm15 = vcmask 605184  }
 0x110   : > { %v1950_v4 = vpack.c.bf16 %v1086_v21, %v1046_v40  ;;  %v2356_v56 = vpop.permute.xlu1 %2355  ;;  %2001 = vmatprep.subr.bf16.mxu1 %v2000_v12 }
 0x111   : > { %v2358_v14 = vunpack.i.h.bf16 %v2356_v56  ;;  %v2357_v11 = vunpack.i.l.bf16 %v2356_v56  ;;  %2003 = vmatpush1.bf16.msra.mxu1 %v2002_v24 }
 0x112   : > { %v2956_v13 = vpop.permute.xlu0 %2350  ;;  %1951 = vmatpush1.bf16.msra.mxu0 %v1950_v4 }
 0x113   : > { %v1167_v59 = vsel %vm1165_vm12, %v2357_v11, %v2358_v14  ;;  %v3331_v16 = vunpack.i.h.bf16 %v2956_v13  ;;  %v2352_v37 = vunpack.i.l.bf16 %v2956_v13 }
 0x114   : > { %v1114_v49 = vpop.permute.xlu1 %1113  ;;  %v1952_v62 = vpack.c.bf16 %v1167_v59, %v1127_v18 }
 0x115   : > { %v1129_v4 = vsel %vm1125_vm13, %v2352_v37, %v3331_v16  ;;  %v1128_v50 = vsel %vm1125_vm13, %v2348_v26, %v2352_v37  ;;  %v1126_v18 = vsel %vm1125_vm13, %v1114_v49, %v2347_v20 }
 0x116   : > { %v2961_v21 = vpop.permute.xlu0 %2360  ;;  %1953 = vmatprep.subr.bf16.mxu0 %v1952_v62 }
 0x117   : > { %v3332_v8 = vunpack.i.h.bf16 %v2961_v21  ;;  %v2362_v56 = vunpack.i.l.bf16 %v2961_v21 }
 0x118   : > { %v1196_v25 = vpop.permute.xlu1 %1195 }
 0x119   : > { %v1169_v43 = vsel %vm1165_vm12, %v2362_v56, %v3332_v8  ;;  %v1168_v17 = vsel %vm1165_vm12, %v2358_v14, %v2362_v56  ;;  %v175_v14 = vld [vmem:[%s2437_s17 + $0x20] sm:$0xff] }
 0x11a   : > { %v1154_v12 = vpop.permute.xlu0 %1153  ;;  %v2004_v24 = vpack.c.bf16 %v1169_v43, %v1129_v4  ;;  %v2006_v40 = vpack.c.bf16 %v1168_v17, %v1128_v50  ;;  %v2401_v43 = vmov 0.0|0.0  }
 0x11b   : > { %v1166_v59 = vsel %vm1165_vm12, %v1154_v12, %v2357_v11  ;;  %v2987_v11 = vld [vmem:[%s3307_s1] sm:$0xff] }
 0x11c   : > { %v1954_v62 = vpack.c.bf16 %v1166_v59, %v1126_v18  ;;  %v1200_v27 = vpop.permute.xlu1 %1199  ;;  %2005 = vmatprep.subr.bf16.mxu1 %v2004_v24 }
 0x11d   : > { %2007 = vmatpush1.bf16.msra.mxu1 %v2006_v40 }
 0x11e   : > { %v1198_v16 = vpop.permute.xlu0 %1197  ;;  %1955 = vmatpush1.bf16.msra.mxu0 %v1954_v62 }
 0x11f   : > { %v1207_v8 = vsel %vm1205_vm15, %v1196_v25, %v1198_v16  ;;  %v1208_v4 = vsel %vm1205_vm15, %v1198_v16, %v1200_v27  ;;  %v3004_v16 = vld [vmem:[%s3307_s1 + $0x10] sm:$0xff] }
 0x120   : > { %v204_v26 = vpop.permute.xlu1 %203  ;;  %1497 = vmatprep.subr.mxu0 %v1207_v8 }
 0x121   : > { %v210_v37 = vsel %vm205_vm0, %v2123_v22, %v204_v26  ;;  %vm3337_vm0 = vcmask 310272  }
 0x122   : > { %v2980_v56 = vpop.permute.xlu0 %1201  ;;  %v2009_v22 = vpack.c.bf16 %v210_v37, %v175_v14 }
 0x123   : > { %v1209_v20 = vsel %vm1205_vm15, %v1200_v27, %v2980_v56 }
 0x124   : > { %v244_v49 = vpop.permute.xlu1 %243  ;;  %1610 = vmatprep.subr.mxu1 %v1209_v20 }
 0x125   : > { %1611 = vmatpush1.msra.mxu1 %v1208_v4  ;;  %v250_v12 = vsel %vm245_vm1, %v2133_v34, %v244_v49  ;;  %vm3338_vm1 = vcmask 302080  }
 0x126   : > { %v1194_v8 = vpop.permute.xlu0 %1193  ;;  %2047 = vmatprep.subr.bf16.mxu1 %v2401_v43  ;;  %1623 = vmatmul.mubr.f32.vlgmr.msra.gmra.mrb[0].mxu1 %v2987_v11 }
 0x127   : > { %2061 = vmatpush1.bf16.msra.mxu1 %v2009_v22  ;;  %v1206_v50 = vsel %vm1205_vm15, %v1194_v8, %v1196_v25  ;;  %1887 = vmatprep.mubr.msk.f32.mxu1 %vm1420_vm7, %v2993_v19  ;;  %v3011_v25 = vld [vmem:[%s3307_s1 + $0x28] sm:$0xff] }
 0x128   : > { %v324_v27 = vpop.permute.xlu1 %323  ;;  %1498 = vmatpush1.msra.mxu0 %v1206_v50  ;;  %2048 = vmatprep.subr.bf16.mxu1 %v2401_v43 }
 0x129   : > { %1510 = vmatmul.mubr.f32.vlgmr.msra.gmra.mrb[0].mxu0 %v2987_v11  ;;  %2008 = vmatprep.subr.bf16.mxu0 %v2401_v43 }
 0x12a   : > { %v284_v17 = vpop.permute.xlu0 %283  ;;  %2010 = vmatpush1.bf16.msra.mxu0 %v2009_v22  ;;  %1879 = vmatprep.mubr.msk.f32.mxu0 %vm1420_vm7, %v2993_v19 }
 0x12b   : > { %v290_v24 = vsel %vm285_vm2, %v2143_v39, %v284_v17  ;;  %2011 = vmatprep.subr.bf16.mxu0 %v2401_v43  ;;  %1629 = vmatmul.mubr.f32.gmra.mrb[2].mxu1 %v3004_v16  ;;  %v330_v39 = vsel %vm325_vm3, %v2153_v60, %v324_v27  ;;  %vm3339_vm2 = vcmask 293888   ;;  %vm3340_vm3 = vcmask 236544  }
 0x12c   : > { %v2012_v40 = vpack.c.bf16 %v290_v24, %v250_v12  ;;  %v404_v18 = vpop.permute.xlu1 %403  ;;  %1888 = vmatprep.mubr.msk.f32.mxu1 %vm1420_vm7, %v3011_v25 }
 0x12d   : > { %1516 = vmatmul.mubr.f32.gmra.mrb[2].mxu0 %v3004_v16 }
 0x12e   : > { %v364_v34 = vpop.permute.xlu0 %363  ;;  %2013 = vmatpush1.bf16.msra.mxu0 %v2012_v40  ;;  %2062 = vmatpush1.bf16.msra.mxu1 %v2012_v40 }
 0x12f   : > { %v370_v59 = vsel %vm365_vm4, %v2163_v3, %v364_v34  ;;  %2014 = vmatprep.subr.bf16.mxu0 %v2401_v43  ;;  %2049 = vmatprep.subr.bf16.mxu1 %v2401_v43  ;;  %v410_v3 = vsel %vm405_vm5, %v2173_v31, %v404_v18  ;;  %vm3341_vm4 = vcmask 228352   ;;  %vm3342_vm5 = vcmask 220160  }
 0x130   : > { %v2015_v62 = vpack.c.bf16 %v370_v59, %v330_v39  ;;  %v484_v26 = vpop.permute.xlu1 %483  ;;  %1880 = vmatprep.mubr.msk.f32.mxu0 %vm1420_vm7, %v3011_v25  ;;  %1635 = vmatmul.mubr.f32.gmra.mrb[4].mxu1 %v3029_v30 }
 0x131   : > { %1522 = vmatmul.mubr.f32.gmra.mrb[4].mxu0 %v3029_v30  ;;  %1889 = vmatprep.mubr.msk.f32.mxu1 %vm1420_vm7, %v3034_v38 }
 0x132   : > { %v444_v60 = vpop.permute.xlu0 %443  ;;  %2016 = vmatpush1.bf16.msra.mxu0 %v2015_v62  ;;  %2063 = vmatpush1.bf16.msra.mxu1 %v2015_v62 }
 0x133   : > { %v450_v14 = vsel %vm445_vm6, %v2183_v2, %v444_v60  ;;  %2017 = vmatprep.subr.bf16.mxu0 %v2401_v43  ;;  %2050 = vmatprep.subr.bf16.mxu1 %v2401_v43  ;;  %v490_v2 = vsel %vm485_vm8, %v2193_v57, %v484_v26  ;;  %vm3344_vm6 = vcmask 769024   ;;  %vm3346_vm8 = vcmask 760832  }
 0x134   : > { %v2018_v37 = vpack.c.bf16 %v450_v14, %v410_v3  ;;  %v564_v20 = vpop.permute.xlu1 %563  ;;  %1881 = vmatprep.mubr.msk.f32.mxu0 %vm1420_vm7, %v3034_v38  ;;  %1641 = vmatmul.mubr.f32.gmra.mrb[6].mxu1 %v3053_v58  ;;  %v3351_v14 = vunpack.i.h.bf16 %v2936_v54  ;;  %v3355_v54 = vunpack.i.h.bf16 %v2961_v21 }
 0x135   : > { %1528 = vmatmul.mubr.f32.gmra.mrb[6].mxu0 %v3053_v58  ;;  %1890 = vmatprep.mubr.msk.f32.mxu1 %vm1420_vm7, %v3058_v0 }
 0x136   : > { %v524_v31 = vpop.permute.xlu0 %523  ;;  %2019 = vmatpush1.bf16.msra.mxu0 %v2018_v37  ;;  %2064 = vmatpush1.bf16.msra.mxu1 %v2018_v37 }
 0x137   : > { %v530_v49 = vsel %vm525_vm9, %v2203_v6, %v524_v31  ;;  %2020 = vmatprep.subr.bf16.mxu0 %v2401_v43  ;;  %2051 = vmatprep.subr.bf16.mxu1 %v2401_v43  ;;  %v570_v6 = vsel %vm565_vm10, %v2213_v33, %v564_v20  ;;  %vm3348_vm9 = vcmask 752640   ;;  %vm3350_vm10 = vcmask 695296  }
 0x138   : > { %v2021_v4 = vpack.c.bf16 %v530_v49, %v490_v2  ;;  %v644_v22 = vpop.permute.xlu1 %643  ;;  %1882 = vmatprep.mubr.msk.f32.mxu0 %vm1420_vm7, %v3058_v0  ;;  %1647 = vmatmul.mubr.f32.gmra.mrb[8].mxu1 %v3077_v29  ;;  %v3354_v49 = vunpack.i.h.bf16 %v2956_v13 }
 0x139   : > { %1534 = vmatmul.mubr.f32.gmra.mrb[8].mxu0 %v3077_v29  ;;  %1891 = vmatprep.mubr.msk.f32.mxu1 %vm1420_vm7, %v3082_v36 }
 0x13a   : > { %v604_v57 = vpop.permute.xlu0 %603  ;;  %2022 = vmatpush1.bf16.msra.mxu0 %v2021_v4  ;;  %2065 = vmatpush1.bf16.msra.mxu1 %v2021_v4 }
 0x13b   : > { %v610_v8 = vsel %vm605_vm11, %v2223_v42, %v604_v57  ;;  %2023 = vmatprep.subr.bf16.mxu0 %v2401_v43  ;;  %2052 = vmatprep.subr.bf16.mxu1 %v2401_v43  ;;  %v650_v42 = vsel %vm3337_vm0, %v2233_v1, %v644_v22  ;;  %vm3353_vm11 = vcmask 678912  }
 0x13c   : > { %v2024_v50 = vpack.c.bf16 %v610_v8, %v570_v6  ;;  %v724_v27 = vpop.permute.xlu1 %723  ;;  %1883 = vmatprep.mubr.msk.f32.mxu0 %vm1420_vm7, %v3082_v36  ;;  %1653 = vmatmul.mubr.f32.gmra.mrb[10].mxu1 %v3101_v55  ;;  %v2402_v6 = vmov 0.0  }
 0x13d   : > { %1540 = vmatmul.mubr.f32.gmra.mrb[10].mxu0 %v3101_v55  ;;  %1892 = vmatprep.mubr.msk.f32.mxu1 %vm1420_vm7, %v3106_v63  ;;  %v730_v7 = vsel %vm3339_vm2, %v2253_v48, %v724_v27 }
 0x13e   : > { %v684_v33 = vpop.permute.xlu0 %683  ;;  %2025 = vmatpush1.bf16.msra.mxu0 %v2024_v50  ;;  %2066 = vmatpush1.bf16.msra.mxu1 %v2024_v50 }
 0x13f   : > { %v690_v17 = vsel %vm3338_vm1, %v2243_v15, %v684_v33  ;;  %2026 = vmatprep.subr.bf16.mxu0 %v2401_v43  ;;  %2053 = vmatprep.subr.bf16.mxu1 %v2401_v43 }
 0x140   : > { %v2027_v12 = vpack.c.bf16 %v690_v17, %v650_v42  ;;  %v804_v24 = vpop.permute.xlu1 %803  ;;  %1884 = vmatprep.mubr.msk.f32.mxu0 %vm1420_vm7, %v3106_v63  ;;  %1659 = vmatmul.mubr.f32.gmra.mrb[12].mxu1 %v3125_v9 }
 0x141   : > { %1546 = vmatmul.mubr.f32.gmra.mrb[12].mxu0 %v3125_v9  ;;  %1893 = vmatprep.mubr.msk.f32.mxu1 %vm1420_vm7, %v3130_v41  ;;  %v810_v48 = vsel %vm3341_vm4, %v2273_v35, %v804_v24 }
 0x142   : > { %v764_v1 = vpop.permute.xlu0 %763  ;;  %2028 = vmatpush1.bf16.msra.mxu0 %v2027_v12  ;;  %2067 = vmatpush1.bf16.msra.mxu1 %v2027_v12 }
 0x143   : > { %v770_v15 = vsel %vm3340_vm3, %v2263_v52, %v764_v1  ;;  %2029 = vmatprep.subr.bf16.mxu0 %v2401_v43  ;;  %2054 = vmatprep.subr.bf16.mxu1 %v2401_v43 }
 0x144   : > { %v2030_v40 = vpack.c.bf16 %v770_v15, %v730_v7  ;;  %v884_v18 = vpop.permute.xlu1 %883  ;;  %1885 = vmatprep.mubr.msk.f32.mxu0 %vm1420_vm7, %v3130_v41  ;;  %1665 = vmatmul.mubr.f32.gmra.mrb[14].mxu1 %v3149_v10 }
 0x145   : > { %1552 = vmatmul.mubr.f32.gmra.mrb[14].mxu0 %v3149_v10  ;;  %1898 = vmatprep.mubr.msk.f32.mxu1 %vm1420_vm7, %v3058_v0  ;;  %v890_v35 = vsel %vm3344_vm6, %v3343_v32, %v884_v18 }
 0x146   : > { %v844_v47 = vpop.permute.xlu0 %843  ;;  %2031 = vmatpush1.bf16.msra.mxu0 %v2030_v40  ;;  %2068 = vmatpush1.bf16.msra.mxu1 %v2030_v40 }
 0x147   : > { %v850_v51 = vsel %vm3342_vm5, %v2283_v5, %v844_v47  ;;  %2032 = vmatprep.subr.bf16.mxu0 %v2401_v43  ;;  %2055 = vmatprep.subr.bf16.mxu1 %v2401_v43 }
 0x148   : > { %v2033_v52 = vpack.c.bf16 %v850_v51, %v810_v48  ;;  %v964_v34 = vpop.permute.xlu1 %963  ;;  %1894 = vmatprep.mubr.msk.f32.mxu0 %vm1420_vm7, %v2679_v28  ;;  %v3347_v28 = vunpack.i.h.bf16 %v2916_v46  ;;  %v3352_v46 = vunpack.i.h.bf16 %v2941_v61 }
 0x14a   : > { %v924_v39 = vpop.permute.xlu0 %923  ;;  %2034 = vmatpush1.bf16.msra.mxu0 %v2033_v52  ;;  %2069 = vmatpush1.bf16.msra.mxu1 %v2033_v52  ;;  %v970_v60 = vsel %vm3348_vm9, %v3347_v28, %v964_v34 }
 0x14b   : > { %v930_v5 = vsel %vm3346_vm8, %v3345_v44, %v924_v39  ;;  %2035 = vmatprep.subr.bf16.mxu0 %v2401_v43  ;;  %2056 = vmatprep.subr.bf16.mxu1 %v2401_v43 }
 0x14c   : > { %v2036_v59 = vpack.c.bf16 %v930_v5, %v890_v35  ;;  %v1044_v62 = vpop.permute.xlu1 %1043 }
 0x14d   : > { %v1050_v37 = vsel %vm1045_vm14, %v3351_v14, %v1044_v62 }
 0x14e   : > { %v1004_v26 = vpop.permute.xlu0 %1003  ;;  %2037 = vmatpush1.bf16.msra.mxu0 %v2036_v59  ;;  %2070 = vmatpush1.bf16.msra.mxu1 %v2036_v59 }
 0x14f   : > { %v1010_v0 = vsel %vm3350_vm10, %v3349_v23, %v1004_v26  ;;  %2038 = vmatprep.subr.bf16.mxu0 %v2401_v43  ;;  %2057 = vmatprep.subr.bf16.mxu1 %v2401_v43 }
 0x150   : > { %v2039_v45 = vpack.c.bf16 %v1010_v0, %v970_v60  ;;  %v1124_v53 = vpop.permute.xlu1 %1123 }
 0x151   : > { %v1130_v4 = vsel %vm1125_vm13, %v3354_v49, %v1124_v53 }
 0x152   : > { %v1084_v3 = vpop.permute.xlu0 %1083  ;;  %2040 = vmatpush1.bf16.msra.mxu0 %v2039_v45  ;;  %2071 = vmatpush1.bf16.msra.mxu1 %v2039_v45 }
 0x153   : > { %v1090_v20 = vsel %vm3353_vm11, %v3352_v46, %v1084_v3  ;;  %2041 = vmatprep.subr.bf16.mxu0 %v2401_v43  ;;  %2058 = vmatprep.subr.bf16.mxu1 %v2401_v43 }
 0x154   : > { %v2042_v31 = vpack.c.bf16 %v1090_v20, %v1050_v37  ;;  %v1204_v57 = vpop.permute.xlu1 %1203 }
 0x155   : > { %v1210_v13 = vsel %vm1205_vm15, %v2980_v56, %v1204_v57 }
 0x156   : > { %v1164_v2 = vpop.permute.xlu0 %1163  ;;  %2043 = vmatpush1.bf16.msra.mxu0 %v2042_v31  ;;  %2072 = vmatpush1.bf16.msra.mxu1 %v2042_v31 }
 0x157   : > { %v1170_v22 = vsel %vm1165_vm12, %v3355_v54, %v1164_v2  ;;  %2044 = vmatprep.subr.bf16.mxu0 %v2401_v43  ;;  %2059 = vmatprep.subr.bf16.mxu1 %v2401_v43 }
 0x158   : > { %v2045_v61 = vpack.c.bf16 %v1170_v22, %v1130_v4 }
 0x15a   : > { %2046 = vmatpush1.bf16.msra.mxu0 %v2045_v61  ;;  %2073 = vmatpush1.bf16.msra.mxu1 %v2045_v61 }
 0x15b   : > { %1723 = vmatprep.subr.mxu0 %v2402_v6  ;;  %2060 = vmatprep.subr.mxu1 %v2402_v6 }
 0x15e   : > { %1724 = vmatpush1.msra.mxu0 %v1210_v13  ;;  %2074 = vmatpush1.msra.mxu1 %v1210_v13 }
 0x15f   : > { %1736 = vmatmul.mubr.f32.vlgmr.msra.gmra.mrb[16].mxu0 %v2987_v11  ;;  %1756 = vmatmul.mubr.f32.vlgmr.msra.gmra.mrb[16].mxu1 %v3077_v29 }
 0x160   : > { %1895 = vmatprep.mubr.msk.f32.mxu0 %vm1420_vm7, %v2993_v19  ;;  %1899 = vmatprep.mubr.msk.f32.mxu1 %vm1420_vm7, %v3082_v36 }
 0x163   : > { %1741 = vmatmul.mubr.f32.gmra.mrb[18].mxu0 %v3004_v16  ;;  %1761 = vmatmul.mubr.f32.gmra.mrb[18].mxu1 %v3101_v55 }
 0x164   : > { %1896 = vmatprep.mubr.msk.f32.mxu0 %vm1420_vm7, %v3011_v25  ;;  %1900 = vmatprep.mubr.msk.f32.mxu1 %vm1420_vm7, %v3106_v63 }
 0x165   : > { %v3239_v16 = vpop.permute.xlu1 %1387 }
 0x167   : > { %1746 = vmatmul.mubr.f32.gmra.mrb[20].mxu0 %v3029_v30  ;;  %1766 = vmatmul.mubr.f32.gmra.mrb[20].mxu1 %v3125_v9  ;;  %v3230_v21 = vpop.permute.xlu0 %1382 }
 0x168   : > { %1897 = vmatprep.mubr.msk.f32.mxu0 %vm1420_vm7, %v3034_v38  ;;  %1901 = vmatprep.mubr.msk.f32.mxu1 %vm1420_vm7, %v3130_v41 }
 0x169   : > { %v3251_v9 = vpop.permute.xlu1 %1392 }
 0x16b   : > { %1751 = vmatmul.mubr.f32.gmra.mrb[22].mxu0 %v3053_v58  ;;  %1771 = vmatmul.mubr.f32.gmra.mrb[22].mxu1 %v3149_v10  ;;  %v3260_v7 = vpop.permute.xlu0 %1397 }
 0x16d   : > { %v1403_v39 = vpop.permute.xlu1 %1402 }
 0x16f   : > { %v1408_v60 = vpop.permute.xlu0 %1407 }
 0x173   : > { %v1418_v6 = vpop.permute.xlu0 %1417 }
 0x175   : > { %v1413_v53 = vpop.permute.xlu1 %1412 }
 0x1f9   : > { %v1624_v56 = vpop.f32.mrb[0].mxu1 }
 0x1fa   : > { %v1625_v11 = vadd.f32 %v1624_v56, %v3230_v21  ;;  %v1626_v19 = vpop.f32.mrb[1].mxu1 }
 0x1fb   : > { %v1627_v43 = vadd.f32 %v1626_v19, %v3230_v21 }
 0x1fc   : > { %v1511_v25 = vpop.f32.mrb[0].mxu0  ;;  %1778 = vst [vmem:[%s3235_s21 + $0x10] sm:$0xff] %v1625_v11 }
 0x1fd   : > { %v1512_v30 = vadd.f32 %v1511_v25, %v3230_v21  ;;  %v1513_v38 = vpop.f32.mrb[1].mxu0  ;;  %1779 = vst [vmem:[%s3235_s21 + $0x18] sm:$0xff] %v1627_v43 }
 0x1fe   : > { %v1514_v58 = vadd.f32 %v1513_v38, %v3230_v21  ;;  %v1630_v29 = vpop.f32.mrb[2].mxu1 }
 0x1ff   : > { %1776 = vst [vmem:[%s3235_s21] sm:$0xff] %v1512_v30  ;;  %v1631_v36 = vadd.f32 %v1630_v29, %v3239_v16  ;;  %v1632_v55 = vpop.f32.mrb[3].mxu1 }
 0x200   : > { %1777 = vst [vmem:[%s3235_s21 + $0x8] sm:$0xff] %v1514_v58  ;;  %v1517_v63 = vpop.f32.mrb[2].mxu0  ;;  %v1633_v8 = vadd.f32 %v1632_v55, %v3239_v16 }
 0x201   : > { %v1518_v50 = vadd.f32 %v1517_v63, %v3239_v16  ;;  %1783 = vst [vmem:[%s3235_s21 + $0x38] sm:$0xff] %v1631_v36  ;;  %v1519_v27 = vpop.f32.mrb[3].mxu0 }
 0x202   : > { %v1520_v33 = vadd.f32 %v1519_v27, %v3239_v16  ;;  %1784 = vst [vmem:[%s3235_s21 + $0x40] sm:$0xff] %v1633_v8 }
 0x203   : > { %1781 = vst [vmem:[%s3235_s21 + $0x28] sm:$0xff] %v1518_v50  ;;  %v1636_v41 = vpop.f32.mrb[4].mxu1 }
 0x204   : > { %1782 = vst [vmem:[%s3235_s21 + $0x30] sm:$0xff] %v1520_v33  ;;  %v1523_v42 = vpop.f32.mrb[4].mxu0  ;;  %v1637_v17 = vadd.f32 %v1636_v41, %v3251_v9  ;;  %v1638_v12 = vpop.f32.mrb[5].mxu1 }
 0x205   : > { %v1524_v24 = vadd.f32 %v1523_v42, %v3251_v9  ;;  %v1525_v10 = vpop.f32.mrb[5].mxu0  ;;  %v1639_v1 = vadd.f32 %v1638_v12, %v3251_v9 }
 0x206   : > { %1788 = vst [vmem:[%s3235_s21 + $0x60] sm:$0xff] %v1637_v17  ;;  %v1526_v15 = vadd.f32 %v1525_v10, %v3251_v9 }
 0x207   : > { %1786 = vst [vmem:[%s3235_s21 + $0x50] sm:$0xff] %v1524_v24  ;;  %1789 = vst [vmem:[%s3235_s21 + $0x68] sm:$0xff] %v1639_v1  ;;  %v1642_v40 = vpop.f32.mrb[6].mxu1 }
 0x208   : > { %1787 = vst [vmem:[%s3235_s21 + $0x58] sm:$0xff] %v1526_v15  ;;  %v1529_v18 = vpop.f32.mrb[6].mxu0  ;;  %v1643_v47 = vadd.f32 %v1642_v40, %v3260_v7  ;;  %v1644_v48 = vpop.f32.mrb[7].mxu1 }
 0x209   : > { %v1530_v51 = vadd.f32 %v1529_v18, %v3260_v7  ;;  %v1531_v52 = vpop.f32.mrb[7].mxu0  ;;  %v1645_v34 = vadd.f32 %v1644_v48, %v3260_v7 }
 0x20a   : > { %1793 = vst [vmem:[%s3235_s21 + $0x88] sm:$0xff] %v1643_v47  ;;  %v1532_v32 = vadd.f32 %v1531_v52, %v3260_v7 }
 0x20b   : > { %1791 = vst [vmem:[%s3235_s21 + $0x78] sm:$0xff] %v1530_v51  ;;  %1794 = vst [vmem:[%s3235_s21 + $0x90] sm:$0xff] %v1645_v34  ;;  %v1648_v35 = vpop.f32.mrb[8].mxu1 }
 0x20c   : > { %1792 = vst [vmem:[%s3235_s21 + $0x80] sm:$0xff] %v1532_v32  ;;  %v1535_v44 = vpop.f32.mrb[8].mxu0  ;;  %v1649_v5 = vadd.f32 %v1648_v35, %v1403_v39  ;;  %v1650_v59 = vpop.f32.mrb[9].mxu1 }
 0x20d   : > { %v1536_v62 = vadd.f32 %v1535_v44, %v1403_v39  ;;  %v1537_v26 = vpop.f32.mrb[9].mxu0  ;;  %v1651_v28 = vadd.f32 %v1650_v59, %v1403_v39 }
 0x20e   : > { %1798 = vst [vmem:[%s3235_s21 + $0xb0] sm:$0xff] %v1649_v5  ;;  %v1538_v23 = vadd.f32 %v1537_v26, %v1403_v39 }
 0x20f   : > { %1796 = vst [vmem:[%s3235_s21 + $0xa0] sm:$0xff] %v1536_v62  ;;  %1799 = vst [vmem:[%s3235_s21 + $0xb8] sm:$0xff] %v1651_v28  ;;  %v1654_v0 = vpop.f32.mrb[10].mxu1 }
 0x210   : > { %1797 = vst [vmem:[%s3235_s21 + $0xa8] sm:$0xff] %v1538_v23  ;;  %v1541_v45 = vpop.f32.mrb[10].mxu0  ;;  %v1655_v3 = vadd.f32 %v1654_v0, %v1408_v60  ;;  %v1656_v14 = vpop.f32.mrb[11].mxu1 }
 0x211   : > { %v1542_v37 = vadd.f32 %v1541_v45, %v1408_v60  ;;  %v1543_v46 = vpop.f32.mrb[11].mxu0  ;;  %v1657_v20 = vadd.f32 %v1656_v14, %v1408_v60 }
 0x212   : > { %1803 = vst [vmem:[%s3235_s21 + $0xd8] sm:$0xff] %v1655_v3  ;;  %v1544_v31 = vadd.f32 %v1543_v46, %v1408_v60 }
 0x213   : > { %1801 = vst [vmem:[%s3235_s21 + $0xc8] sm:$0xff] %v1542_v37  ;;  %1804 = vst [vmem:[%s3235_s21 + $0xe0] sm:$0xff] %v1657_v20  ;;  %v1660_v2 = vpop.f32.mrb[12].mxu1 }
 0x214   : > { %1802 = vst [vmem:[%s3235_s21 + $0xd0] sm:$0xff] %v1544_v31  ;;  %v1547_v49 = vpop.f32.mrb[12].mxu0  ;;  %v1661_v4 = vadd.f32 %v1660_v2, %v1413_v53  ;;  %v1662_v54 = vpop.f32.mrb[13].mxu1 }
 0x215   : > { %v1548_v22 = vadd.f32 %v1547_v49, %v1413_v53  ;;  %v1549_v61 = vpop.f32.mrb[13].mxu0  ;;  %v1663_v57 = vadd.f32 %v1662_v54, %v1413_v53 }
 0x216   : > { %1808 = vst [vmem:[%s3235_s21 + $0x100] sm:$0xff] %v1661_v4  ;;  %v1550_v13 = vadd.f32 %v1549_v61, %v1413_v53 }
 0x217   : > { %1806 = vst [vmem:[%s3235_s21 + $0xf0] sm:$0xff] %v1548_v22  ;;  %1809 = vst [vmem:[%s3235_s21 + $0x108] sm:$0xff] %v1663_v57  ;;  %v1666_v56 = vpop.f32.mrb[14].mxu1 }
 0x218   : > { %1807 = vst [vmem:[%s3235_s21 + $0xf8] sm:$0xff] %v1550_v13  ;;  %v1553_v11 = vpop.f32.mrb[14].mxu0  ;;  %v1667_v19 = vadd.f32 %v1666_v56, %v1418_v6  ;;  %v1668_v43 = vpop.f32.mrb[15].mxu1 }
 0x219   : > { %v1554_v25 = vadd.f32 %v1553_v11, %v1418_v6  ;;  %v1555_v30 = vpop.f32.mrb[15].mxu0  ;;  %v1669_v38 = vadd.f32 %v1668_v43, %v1418_v6 }
 0x21a   : > { %1813 = vst [vmem:[%s3235_s21 + $0x128] sm:$0xff] %v1667_v19  ;;  %v1556_v58 = vadd.f32 %v1555_v30, %v1418_v6 }
 0x21b   : > { %1811 = vst [vmem:[%s3235_s21 + $0x118] sm:$0xff] %v1554_v25  ;;  %1814 = vst [vmem:[%s3235_s21 + $0x130] sm:$0xff] %v1669_v38 }
 0x21c   : > { %1812 = vst [vmem:[%s3235_s21 + $0x120] sm:$0xff] %v1556_v58 }
 0x232   : > { %v1737_v29 = vpop.f32.mrb[16].mxu0  ;;  %v1757_v36 = vpop.f32.mrb[16].mxu1 }
 0x233   : > { %v1738_v55 = vadd.f32 %v1737_v29, %v3230_v21  ;;  %v1758_v63 = vadd.f32 %v1757_v36, %v1403_v39  ;;  %v1739_v8 = vpop.f32.mrb[17].mxu0  ;;  %v1759_v50 = vpop.f32.mrb[17].mxu1 }
 0x235   : > { %1780 = vst [vmem:[%s3235_s21 + $0x20] sm:$0xff] %v1738_v55  ;;  %1800 = vst [vmem:[%s3235_s21 + $0xc0] sm:$0xff] %v1758_v63 }
 0x236   : > { %v1742_v27 = vpop.f32.mrb[18].mxu0  ;;  %v1762_v33 = vpop.f32.mrb[18].mxu1 }
 0x237   : > { %v1743_v41 = vadd.f32 %v1742_v27, %v3239_v16  ;;  %v1763_v42 = vadd.f32 %v1762_v33, %v1408_v60  ;;  %v1744_v17 = vpop.f32.mrb[19].mxu0  ;;  %v1764_v12 = vpop.f32.mrb[19].mxu1 }
 0x239   : > { %1785 = vst [vmem:[%s3235_s21 + $0x48] sm:$0xff] %v1743_v41  ;;  %1805 = vst [vmem:[%s3235_s21 + $0xe8] sm:$0xff] %v1763_v42 }
 0x23a   : > { %v1747_v24 = vpop.f32.mrb[20].mxu0  ;;  %v1767_v21 = vpop.f32.mrb[20].mxu1 }
 0x23b   : > { %v1748_v10 = vadd.f32 %v1747_v24, %v3251_v9  ;;  %v1768_v1 = vadd.f32 %v1767_v21, %v1413_v53  ;;  %v1749_v15 = vpop.f32.mrb[21].mxu0  ;;  %v1769_v40 = vpop.f32.mrb[21].mxu1 }
 0x23d   : > { %1790 = vst [vmem:[%s3235_s21 + $0x70] sm:$0xff] %v1748_v10  ;;  %1810 = vst [vmem:[%s3235_s21 + $0x110] sm:$0xff] %v1768_v1 }
 0x23e   : > { %v1752_v18 = vpop.f32.mrb[22].mxu0  ;;  %v1772_v47 = vpop.f32.mrb[22].mxu1 }
 0x23f   : > { %v1753_v16 = vadd.f32 %v1752_v18, %v3260_v7  ;;  %v1773_v48 = vadd.f32 %v1772_v47, %v1418_v6  ;;  %v1754_v51 = vpop.f32.mrb[23].mxu0  ;;  %v1774_v52 = vpop.f32.mrb[23].mxu1 }
 0x241   : > { %1795 = vst [vmem:[%s3235_s21 + $0x98] sm:$0xff] %v1753_v16  ;;  %1815 = vst [vmem:[%s3235_s21 + $0x138] sm:$0xff] %v1773_v48 }
 0x242 PF: > { %s13_s12 = sadd.s32 1, %s2372_s12  }
 0x243   : > { %p10_p4 = scmp.ge.s32.totalorder %s13_s12, 4  }
 0x245   :  { %12 = sbr.rel (!%p10_p4) target bundleno = 1 (0x1), region = 62 }

</bundles_post_ra>
